<compile_context>
chip_gen: v6e
topology: v6e:2x2x1
jax: 0.10.0
libtpu: 0.0.40
codegen_flags: <defaults>
</compile_context>

<pallas_src>
import math
import jax
import jax.numpy as jnp
from jax.experimental import pallas as pl
from jax.experimental.pallas import tpu as pltpu

# Small, self-consistent config (d_model was elided in the reference module).
NUM_LAYERS = 2
D_MODEL = 32
N_HEADS = 4
HEAD_DIM = D_MODEL // N_HEADS
D_FF = 64
SEQ = 8
BATCH = 2
LN_EPS = 1e-5


def encoder_stack_kernel(x_ref, wqkv_ref, bqkv_ref, wo_ref, bo_ref,
                         w1_ref, b1_ref, w2_ref, b2_ref,
                         g1_ref, be1_ref, g2_ref, be2_ref,
                         o_ref):
    """Whole encoder stack in one invocation. x_ref: (B, S, D)."""
    B, S, D = x_ref.shape
    num_layers = wqkv_ref.shape[0]

    # All row-wise ops (projections, LayerNorm, FFN) run on the flat (B*S, D) slab.
    h = x_ref[...].astype(jnp.float32).reshape(B * S, D)

    for l in range(num_layers):                    # static unroll over layers
        wqkv = wqkv_ref[l]                         # (D, 3D)  pre-transposed, Q cols pre-scaled
        bqkv = bqkv_ref[l]                         # (1, 3D)
        wo, bo = wo_ref[l], bo_ref[l]              # (D, D), (1, D)
        w1, b1 = w1_ref[l], b1_ref[l]              # (D, D_FF), (1, D_FF)
        w2, b2 = w2_ref[l], b2_ref[l]              # (D_FF, D), (1, D)
        g1, be1 = g1_ref[l], be1_ref[l]            # (1, D)
        g2, be2 = g2_ref[l], be2_ref[l]            # (1, D)

        # ---- Multi-head self-attention ----------------------------------
        qkv = jnp.dot(h, wqkv, preferred_element_type=jnp.float32) + bqkv   # (B*S, 3D)
        qkv = qkv.reshape(B, S, 3 * D)
        q = qkv[:, :, 0:D]
        k = qkv[:, :, D:2 * D]
        v = qkv[:, :, 2 * D:3 * D]

        ctx_heads = []
        for hh in range(N_HEADS):                  # static loop; batched over B via einsum
            lo = hh * HEAD_DIM
            hi = lo + HEAD_DIM
            s = jnp.einsum('bqd,bkd->bqk', q[:, :, lo:hi], k[:, :, lo:hi],
                           preferred_element_type=jnp.float32)              # (B, S, S)
            m = jnp.max(s, axis=-1, keepdims=True)
            p = jnp.exp(s - m)
            p = p * pl.reciprocal(jnp.sum(p, axis=-1, keepdims=True), approx=True)
            ctx_heads.append(jnp.einsum('bqk,bkd->bqd', p, v[:, :, lo:hi],
                                        preferred_element_type=jnp.float32))
        ctx = jnp.concatenate(ctx_heads, axis=-1).reshape(B * S, D)

        attn = jnp.dot(ctx, wo, preferred_element_type=jnp.float32) + bo

        # ---- residual + LayerNorm1 ---------------------------------------
        h1 = h + attn
        mu1 = jnp.mean(h1, axis=-1, keepdims=True)
        var1 = jnp.mean((h1 - mu1) ** 2, axis=-1, keepdims=True)
        h1 = (h1 - mu1) * jax.lax.rsqrt(var1 + LN_EPS) * g1 + be1

        # ---- Feed-forward --------------------------------------------------
        f = jnp.dot(h1, w1, preferred_element_type=jnp.float32) + b1
        f = jnp.maximum(f, 0.0)
        f = jnp.dot(f, w2, preferred_element_type=jnp.float32) + b2

        # ---- residual + LayerNorm2 ---------------------------------------
        h2 = h1 + f
        mu2 = jnp.mean(h2, axis=-1, keepdims=True)
        var2 = jnp.mean((h2 - mu2) ** 2, axis=-1, keepdims=True)
        h = (h2 - mu2) * jax.lax.rsqrt(var2 + LN_EPS) * g2 + be2

    o_ref[...] = h.reshape(B, S, D).astype(o_ref.dtype)


@jax.jit
def transformer_encoder(x_sbd, params):
    """x_sbd: (S, B, D) — PyTorch batch_first=False convention."""
    S, B, D = x_sbd.shape
    x = jnp.transpose(x_sbd, (1, 0, 2))            # (B, S, D) for the kernel

    y = pl.pallas_call(
        encoder_stack_kernel,
        out_shape=jax.ShapeDtypeStruct((B, S, D), jnp.float32),
        # No grid: every operand is a single full VMEM-resident block
        # (total weights + activations << VMEM on all generations).
        compiler_params=pltpu.CompilerParams(vmem_limit_bytes=32 * 1024 * 1024),
    )(x,
      params["wqkv"], params["bqkv"], params["wo"], params["bo"],
      params["w1"], params["b1"], params["w2"], params["b2"],
      params["g1"], params["beta1"], params["g2"], params["beta2"])

    return jnp.transpose(y, (1, 0, 2))             # back to (S, B, D)


def init_params(key):
    """Deterministic PyTorch-shaped params, pre-transposed/stacked for the kernel."""
    def uniform(k, shape, fan_in):
        bound = 1.0 / math.sqrt(fan_in)
        return jax.random.uniform(k, shape, jnp.float32, -bound, bound)

    scale = 1.0 / math.sqrt(HEAD_DIM)
    names = ["wqkv", "bqkv", "wo", "bo", "w1", "b1", "w2", "b2",
             "g1", "beta1", "g2", "beta2"]
    stacks = {n: [] for n in names}

    for _ in range(NUM_LAYERS):
        key, *ks = jax.random.split(key, 9)
        # PyTorch layouts: in_proj_weight (3D, D), out_proj.weight (D, D),
        # linear1.weight (D_FF, D), linear2.weight (D, D_FF).
        wqkv = uniform(ks[0], (3 * D_MODEL, D_MODEL), D_MODEL)
        bqkv = uniform(ks[1], (3 * D_MODEL,), D_MODEL)
        wo = uniform(ks[2], (D_MODEL, D_MODEL), D_MODEL)
        bo = uniform(ks[3], (D_MODEL,), D_MODEL)
        w1 = uniform(ks[4], (D_FF, D_MODEL), D_MODEL)
        b1 = uniform(ks[5], (D_FF,), D_MODEL)
        w2 = uniform(ks[6], (D_MODEL, D_FF), D_FF)
        b2 = uniform(ks[7], (D_MODEL,), D_FF)

        # Pre-transpose (contraction dim in sublanes, output dim in lanes) and
        # fold the 1/sqrt(head_dim) attention scale into the Q block.
        wqkv_t = wqkv.T.at[:, :D_MODEL].multiply(scale)      # (D, 3D)
        bqkv_s = bqkv.at[:D_MODEL].multiply(scale)

        stacks["wqkv"].append(wqkv_t)
        stacks["bqkv"].append(bqkv_s.reshape(1, 3 * D_MODEL))
        stacks["wo"].append(wo.T)                             # (D, D)
        stacks["bo"].append(bo.reshape(1, D_MODEL))
        stacks["w1"].append(w1.T)                             # (D, D_FF)
        stacks["b1"].append(b1.reshape(1, D_FF))
        stacks["w2"].append(w2.T)                             # (D_FF, D)
        stacks["b2"].append(b2.reshape(1, D_MODEL))
        stacks["g1"].append(jnp.ones((1, D_MODEL), jnp.float32))
        stacks["beta1"].append(jnp.zeros((1, D_MODEL), jnp.float32))
        stacks["g2"].append(jnp.ones((1, D_MODEL), jnp.float32))
        stacks["beta2"].append(jnp.zeros((1, D_MODEL), jnp.float32))

    return {n: jnp.stack(v) for n, v in stacks.items()}


if __name__ == "__main__":
    key = jax.random.PRNGKey(0)
    kx, kp = jax.random.split(key)

    # PyTorch-convention input: (seq, batch, d_model)
    x = jax.random.normal(kx, (SEQ, BATCH, D_MODEL), jnp.float32)
    params = init_params(kp)

    y = transformer_encoder(x, params)
    y = jax.block_until_ready(y)

    assert y.shape == (SEQ, BATCH, D_MODEL)
    assert bool(jnp.all(jnp.isfinite(y)))
    print("KERNEL_OK")
</pallas_src>

<mosaic_0001>
module attributes {stable_mosaic.version = 11 : i64} {
  func.func @encoder_stack_kernel(%arg0: memref<2x8x32xf32, #tpu.memory_space<vmem>>, %arg1: memref<2x32x96xf32, #tpu.memory_space<vmem>>, %arg2: memref<2x1x96xf32, #tpu.memory_space<vmem>>, %arg3: memref<2x32x32xf32, #tpu.memory_space<vmem>>, %arg4: memref<2x1x32xf32, #tpu.memory_space<vmem>>, %arg5: memref<2x32x64xf32, #tpu.memory_space<vmem>>, %arg6: memref<2x1x64xf32, #tpu.memory_space<vmem>>, %arg7: memref<2x64x32xf32, #tpu.memory_space<vmem>>, %arg8: memref<2x1x32xf32, #tpu.memory_space<vmem>>, %arg9: memref<2x1x32xf32, #tpu.memory_space<vmem>>, %arg10: memref<2x1x32xf32, #tpu.memory_space<vmem>>, %arg11: memref<2x1x32xf32, #tpu.memory_space<vmem>>, %arg12: memref<2x1x32xf32, #tpu.memory_space<vmem>>, %arg13: memref<2x8x32xf32, #tpu.memory_space<vmem>>) attributes {dimension_semantics = [], scalar_prefetch = 0 : i64, scratch_operands = 0 : i64, tpu.core_type = #tpu.core_type<tc>} {
    %c0 = arith.constant 0 : index
    %c0_0 = arith.constant 0 : index
    %c0_1 = arith.constant 0 : index
    %0 = vector.load %arg0[%c0, %c0_0, %c0_1] : memref<2x8x32xf32, #tpu.memory_space<vmem>>, vector<2x8x32xf32>
    %1 = vector.shape_cast %0 : vector<2x8x32xf32> to vector<16x32xf32>
    %c0_2 = arith.constant 0 : index
    %c0_3 = arith.constant 0 : index
    %c0_4 = arith.constant 0 : index
    %2 = vector.load %arg1[%c0_2, %c0_3, %c0_4] : memref<2x32x96xf32, #tpu.memory_space<vmem>>, vector<1x32x96xf32>
    %3 = vector.shape_cast %2 : vector<1x32x96xf32> to vector<32x96xf32>
    %c0_5 = arith.constant 0 : index
    %c0_6 = arith.constant 0 : index
    %c0_7 = arith.constant 0 : index
    %4 = vector.load %arg2[%c0_5, %c0_6, %c0_7] : memref<2x1x96xf32, #tpu.memory_space<vmem>>, vector<1x1x96xf32>
    %5 = vector.shape_cast %4 : vector<1x1x96xf32> to vector<1x96xf32>
    %c0_8 = arith.constant 0 : index
    %c0_9 = arith.constant 0 : index
    %c0_10 = arith.constant 0 : index
    %6 = vector.load %arg3[%c0_8, %c0_9, %c0_10] : memref<2x32x32xf32, #tpu.memory_space<vmem>>, vector<1x32x32xf32>
    %7 = vector.shape_cast %6 : vector<1x32x32xf32> to vector<32x32xf32>
    %c0_11 = arith.constant 0 : index
    %c0_12 = arith.constant 0 : index
    %c0_13 = arith.constant 0 : index
    %8 = vector.load %arg4[%c0_11, %c0_12, %c0_13] : memref<2x1x32xf32, #tpu.memory_space<vmem>>, vector<1x1x32xf32>
    %9 = vector.shape_cast %8 : vector<1x1x32xf32> to vector<1x32xf32>
    %c0_14 = arith.constant 0 : index
    %c0_15 = arith.constant 0 : index
    %c0_16 = arith.constant 0 : index
    %10 = vector.load %arg5[%c0_14, %c0_15, %c0_16] : memref<2x32x64xf32, #tpu.memory_space<vmem>>, vector<1x32x64xf32>
    %11 = vector.shape_cast %10 : vector<1x32x64xf32> to vector<32x64xf32>
    %c0_17 = arith.constant 0 : index
    %c0_18 = arith.constant 0 : index
    %c0_19 = arith.constant 0 : index
    %12 = vector.load %arg6[%c0_17, %c0_18, %c0_19] : memref<2x1x64xf32, #tpu.memory_space<vmem>>, vector<1x1x64xf32>
    %13 = vector.shape_cast %12 : vector<1x1x64xf32> to vector<1x64xf32>
    %c0_20 = arith.constant 0 : index
    %c0_21 = arith.constant 0 : index
    %c0_22 = arith.constant 0 : index
    %14 = vector.load %arg7[%c0_20, %c0_21, %c0_22] : memref<2x64x32xf32, #tpu.memory_space<vmem>>, vector<1x64x32xf32>
    %15 = vector.shape_cast %14 : vector<1x64x32xf32> to vector<64x32xf32>
    %c0_23 = arith.constant 0 : index
    %c0_24 = arith.constant 0 : index
    %c0_25 = arith.constant 0 : index
    %16 = vector.load %arg8[%c0_23, %c0_24, %c0_25] : memref<2x1x32xf32, #tpu.memory_space<vmem>>, vector<1x1x32xf32>
    %17 = vector.shape_cast %16 : vector<1x1x32xf32> to vector<1x32xf32>
    %c0_26 = arith.constant 0 : index
    %c0_27 = arith.constant 0 : index
    %c0_28 = arith.constant 0 : index
    %18 = vector.load %arg9[%c0_26, %c0_27, %c0_28] : memref<2x1x32xf32, #tpu.memory_space<vmem>>, vector<1x1x32xf32>
    %19 = vector.shape_cast %18 : vector<1x1x32xf32> to vector<1x32xf32>
    %c0_29 = arith.constant 0 : index
    %c0_30 = arith.constant 0 : index
    %c0_31 = arith.constant 0 : index
    %20 = vector.load %arg10[%c0_29, %c0_30, %c0_31] : memref<2x1x32xf32, #tpu.memory_space<vmem>>, vector<1x1x32xf32>
    %21 = vector.shape_cast %20 : vector<1x1x32xf32> to vector<1x32xf32>
    %c0_32 = arith.constant 0 : index
    %c0_33 = arith.constant 0 : index
    %c0_34 = arith.constant 0 : index
    %22 = vector.load %arg11[%c0_32, %c0_33, %c0_34] : memref<2x1x32xf32, #tpu.memory_space<vmem>>, vector<1x1x32xf32>
    %23 = vector.shape_cast %22 : vector<1x1x32xf32> to vector<1x32xf32>
    %c0_35 = arith.constant 0 : index
    %c0_36 = arith.constant 0 : index
    %c0_37 = arith.constant 0 : index
    %24 = vector.load %arg12[%c0_35, %c0_36, %c0_37] : memref<2x1x32xf32, #tpu.memory_space<vmem>>, vector<1x1x32xf32>
    %25 = vector.shape_cast %24 : vector<1x1x32xf32> to vector<1x32xf32>
    %cst = arith.constant dense<0.000000e+00> : vector<16x96xf32>
    %26 = tpu.matmul %1, %3, %cst {dimension_numbers = #tpu.dot_dimension_numbers<[1], [0], [0], [1], [0, 0, 1, 1], [], []>} : vector<16x32xf32>, vector<32x96xf32>, vector<16x96xf32> -> vector<16x96xf32>
    %27 = vector.broadcast %5 : vector<1x96xf32> to vector<16x96xf32>
    %28 = arith.addf %26, %27 : vector<16x96xf32>
    %29 = vector.shape_cast %28 : vector<16x96xf32> to vector<2x8x96xf32>
    %30 = vector.extract_strided_slice %29 {offsets = [0, 0, 0], sizes = [2, 8, 32], strides = [1, 1, 1]} : vector<2x8x96xf32> to vector<2x8x32xf32>
    %31 = vector.extract_strided_slice %29 {offsets = [0, 0, 32], sizes = [2, 8, 32], strides = [1, 1, 1]} : vector<2x8x96xf32> to vector<2x8x32xf32>
    %32 = vector.extract_strided_slice %29 {offsets = [0, 0, 64], sizes = [2, 8, 32], strides = [1, 1, 1]} : vector<2x8x96xf32> to vector<2x8x32xf32>
    %33 = vector.extract_strided_slice %30 {offsets = [0, 0, 0], sizes = [2, 8, 8], strides = [1, 1, 1]} : vector<2x8x32xf32> to vector<2x8x8xf32>
    %34 = vector.extract_strided_slice %31 {offsets = [0, 0, 0], sizes = [2, 8, 8], strides = [1, 1, 1]} : vector<2x8x32xf32> to vector<2x8x8xf32>
    "tpu.trace_start"() <{level = 10 : i32, message = "bqd,bkd->bqk"}> : () -> ()
    %cst_38 = arith.constant dense<0.000000e+00> : vector<2x8x8xf32>
    %35 = tpu.matmul %33, %34, %cst_38 {dimension_numbers = #tpu.dot_dimension_numbers<[2], [2], [1], [1], [0, 0, 0, 1, 1, 1], [0], [0]>} : vector<2x8x8xf32>, vector<2x8x8xf32>, vector<2x8x8xf32> -> vector<2x8x8xf32>
    "tpu.trace_stop"() : () -> ()
    %cst_39 = arith.constant dense<0xFF800000> : vector<2x8xf32>
    %36 = vector.multi_reduction <maximumf>, %35, %cst_39 [2] : vector<2x8x8xf32> to vector<2x8xf32>
    %37 = vector.shape_cast %36 : vector<2x8xf32> to vector<2x8x1xf32>
    %38 = vector.broadcast %37 : vector<2x8x1xf32> to vector<2x8x8xf32>
    %39 = arith.subf %35, %38 : vector<2x8x8xf32>
    %40 = math.exp %39 : vector<2x8x8xf32>
    %cst_40 = arith.constant dense<0.000000e+00> : vector<2x8xf32>
    %41 = vector.multi_reduction <add>, %40, %cst_40 [2] : vector<2x8x8xf32> to vector<2x8xf32>
    %42 = vector.shape_cast %41 : vector<2x8xf32> to vector<2x8x1xf32>
    %43 = tpu.reciprocal %42 {approx = true} : vector<2x8x1xf32> -> vector<2x8x1xf32>
    %44 = vector.broadcast %43 : vector<2x8x1xf32> to vector<2x8x8xf32>
    %45 = arith.mulf %40, %44 : vector<2x8x8xf32>
    %46 = vector.extract_strided_slice %32 {offsets = [0, 0, 0], sizes = [2, 8, 8], strides = [1, 1, 1]} : vector<2x8x32xf32> to vector<2x8x8xf32>
    "tpu.trace_start"() <{level = 10 : i32, message = "bqk,bkd->bqd"}> : () -> ()
    %cst_41 = arith.constant dense<0.000000e+00> : vector<2x8x8xf32>
    %47 = tpu.matmul %45, %46, %cst_41 {dimension_numbers = #tpu.dot_dimension_numbers<[2], [1], [1], [2], [0, 0, 0, 1, 1, 2], [0], [0]>} : vector<2x8x8xf32>, vector<2x8x8xf32>, vector<2x8x8xf32> -> vector<2x8x8xf32>
    "tpu.trace_stop"() : () -> ()
    %48 = vector.extract_strided_slice %30 {offsets = [0, 0, 8], sizes = [2, 8, 8], strides = [1, 1, 1]} : vector<2x8x32xf32> to vector<2x8x8xf32>
    %49 = vector.extract_strided_slice %31 {offsets = [0, 0, 8], sizes = [2, 8, 8], strides = [1, 1, 1]} : vector<2x8x32xf32> to vector<2x8x8xf32>
    "tpu.trace_start"() <{level = 10 : i32, message = "bqd,bkd->bqk"}> : () -> ()
    %cst_42 = arith.constant dense<0.000000e+00> : vector<2x8x8xf32>
    %50 = tpu.matmul %48, %49, %cst_42 {dimension_numbers = #tpu.dot_dimension_numbers<[2], [2], [1], [1], [0, 0, 0, 1, 1, 1], [0], [0]>} : vector<2x8x8xf32>, vector<2x8x8xf32>, vector<2x8x8xf32> -> vector<2x8x8xf32>
    "tpu.trace_stop"() : () -> ()
    %cst_43 = arith.constant dense<0xFF800000> : vector<2x8xf32>
    %51 = vector.multi_reduction <maximumf>, %50, %cst_43 [2] : vector<2x8x8xf32> to vector<2x8xf32>
    %52 = vector.shape_cast %51 : vector<2x8xf32> to vector<2x8x1xf32>
    %53 = vector.broadcast %52 : vector<2x8x1xf32> to vector<2x8x8xf32>
    %54 = arith.subf %50, %53 : vector<2x8x8xf32>
    %55 = math.exp %54 : vector<2x8x8xf32>
    %cst_44 = arith.constant dense<0.000000e+00> : vector<2x8xf32>
    %56 = vector.multi_reduction <add>, %55, %cst_44 [2] : vector<2x8x8xf32> to vector<2x8xf32>
    %57 = vector.shape_cast %56 : vector<2x8xf32> to vector<2x8x1xf32>
    %58 = tpu.reciprocal %57 {approx = true} : vector<2x8x1xf32> -> vector<2x8x1xf32>
    %59 = vector.broadcast %58 : vector<2x8x1xf32> to vector<2x8x8xf32>
    %60 = arith.mulf %55, %59 : vector<2x8x8xf32>
    %61 = vector.extract_strided_slice %32 {offsets = [0, 0, 8], sizes = [2, 8, 8], strides = [1, 1, 1]} : vector<2x8x32xf32> to vector<2x8x8xf32>
    "tpu.trace_start"() <{level = 10 : i32, message = "bqk,bkd->bqd"}> : () -> ()
    %cst_45 = arith.constant dense<0.000000e+00> : vector<2x8x8xf32>
    %62 = tpu.matmul %60, %61, %cst_45 {dimension_numbers = #tpu.dot_dimension_numbers<[2], [1], [1], [2], [0, 0, 0, 1, 1, 2], [0], [0]>} : vector<2x8x8xf32>, vector<2x8x8xf32>, vector<2x8x8xf32> -> vector<2x8x8xf32>
    "tpu.trace_stop"() : () -> ()
    %63 = vector.extract_strided_slice %30 {offsets = [0, 0, 16], sizes = [2, 8, 8], strides = [1, 1, 1]} : vector<2x8x32xf32> to vector<2x8x8xf32>
    %64 = vector.extract_strided_slice %31 {offsets = [0, 0, 16], sizes = [2, 8, 8], strides = [1, 1, 1]} : vector<2x8x32xf32> to vector<2x8x8xf32>
    "tpu.trace_start"() <{level = 10 : i32, message = "bqd,bkd->bqk"}> : () -> ()
    %cst_46 = arith.constant dense<0.000000e+00> : vector<2x8x8xf32>
    %65 = tpu.matmul %63, %64, %cst_46 {dimension_numbers = #tpu.dot_dimension_numbers<[2], [2], [1], [1], [0, 0, 0, 1, 1, 1], [0], [0]>} : vector<2x8x8xf32>, vector<2x8x8xf32>, vector<2x8x8xf32> -> vector<2x8x8xf32>
    "tpu.trace_stop"() : () -> ()
    %cst_47 = arith.constant dense<0xFF800000> : vector<2x8xf32>
    %66 = vector.multi_reduction <maximumf>, %65, %cst_47 [2] : vector<2x8x8xf32> to vector<2x8xf32>
    %67 = vector.shape_cast %66 : vector<2x8xf32> to vector<2x8x1xf32>
    %68 = vector.broadcast %67 : vector<2x8x1xf32> to vector<2x8x8xf32>
    %69 = arith.subf %65, %68 : vector<2x8x8xf32>
    %70 = math.exp %69 : vector<2x8x8xf32>
    %cst_48 = arith.constant dense<0.000000e+00> : vector<2x8xf32>
    %71 = vector.multi_reduction <add>, %70, %cst_48 [2] : vector<2x8x8xf32> to vector<2x8xf32>
    %72 = vector.shape_cast %71 : vector<2x8xf32> to vector<2x8x1xf32>
    %73 = tpu.reciprocal %72 {approx = true} : vector<2x8x1xf32> -> vector<2x8x1xf32>
    %74 = vector.broadcast %73 : vector<2x8x1xf32> to vector<2x8x8xf32>
    %75 = arith.mulf %70, %74 : vector<2x8x8xf32>
    %76 = vector.extract_strided_slice %32 {offsets = [0, 0, 16], sizes = [2, 8, 8], strides = [1, 1, 1]} : vector<2x8x32xf32> to vector<2x8x8xf32>
    "tpu.trace_start"() <{level = 10 : i32, message = "bqk,bkd->bqd"}> : () -> ()
    %cst_49 = arith.constant dense<0.000000e+00> : vector<2x8x8xf32>
    %77 = tpu.matmul %75, %76, %cst_49 {dimension_numbers = #tpu.dot_dimension_numbers<[2], [1], [1], [2], [0, 0, 0, 1, 1, 2], [0], [0]>} : vector<2x8x8xf32>, vector<2x8x8xf32>, vector<2x8x8xf32> -> vector<2x8x8xf32>
    "tpu.trace_stop"() : () -> ()
    %78 = vector.extract_strided_slice %30 {offsets = [0, 0, 24], sizes = [2, 8, 8], strides = [1, 1, 1]} : vector<2x8x32xf32> to vector<2x8x8xf32>
    %79 = vector.extract_strided_slice %31 {offsets = [0, 0, 24], sizes = [2, 8, 8], strides = [1, 1, 1]} : vector<2x8x32xf32> to vector<2x8x8xf32>
    "tpu.trace_start"() <{level = 10 : i32, message = "bqd,bkd->bqk"}> : () -> ()
    %cst_50 = arith.constant dense<0.000000e+00> : vector<2x8x8xf32>
    %80 = tpu.matmul %78, %79, %cst_50 {dimension_numbers = #tpu.dot_dimension_numbers<[2], [2], [1], [1], [0, 0, 0, 1, 1, 1], [0], [0]>} : vector<2x8x8xf32>, vector<2x8x8xf32>, vector<2x8x8xf32> -> vector<2x8x8xf32>
    "tpu.trace_stop"() : () -> ()
    %cst_51 = arith.constant dense<0xFF800000> : vector<2x8xf32>
    %81 = vector.multi_reduction <maximumf>, %80, %cst_51 [2] : vector<2x8x8xf32> to vector<2x8xf32>
    %82 = vector.shape_cast %81 : vector<2x8xf32> to vector<2x8x1xf32>
    %83 = vector.broadcast %82 : vector<2x8x1xf32> to vector<2x8x8xf32>
    %84 = arith.subf %80, %83 : vector<2x8x8xf32>
    %85 = math.exp %84 : vector<2x8x8xf32>
    %cst_52 = arith.constant dense<0.000000e+00> : vector<2x8xf32>
    %86 = vector.multi_reduction <add>, %85, %cst_52 [2] : vector<2x8x8xf32> to vector<2x8xf32>
    %87 = vector.shape_cast %86 : vector<2x8xf32> to vector<2x8x1xf32>
    %88 = tpu.reciprocal %87 {approx = true} : vector<2x8x1xf32> -> vector<2x8x1xf32>
    %89 = vector.broadcast %88 : vector<2x8x1xf32> to vector<2x8x8xf32>
    %90 = arith.mulf %85, %89 : vector<2x8x8xf32>
    %91 = vector.extract_strided_slice %32 {offsets = [0, 0, 24], sizes = [2, 8, 8], strides = [1, 1, 1]} : vector<2x8x32xf32> to vector<2x8x8xf32>
    "tpu.trace_start"() <{level = 10 : i32, message = "bqk,bkd->bqd"}> : () -> ()
    %cst_53 = arith.constant dense<0.000000e+00> : vector<2x8x8xf32>
    %92 = tpu.matmul %90, %91, %cst_53 {dimension_numbers = #tpu.dot_dimension_numbers<[2], [1], [1], [2], [0, 0, 0, 1, 1, 2], [0], [0]>} : vector<2x8x8xf32>, vector<2x8x8xf32>, vector<2x8x8xf32> -> vector<2x8x8xf32>
    "tpu.trace_stop"() : () -> ()
    %93 = tpu.concatenate %47, %62, %77, %92 in 2 : vector<2x8x8xf32>, vector<2x8x8xf32>, vector<2x8x8xf32>, vector<2x8x8xf32> -> vector<2x8x32xf32>
    %94 = vector.shape_cast %93 : vector<2x8x32xf32> to vector<16x32xf32>
    %cst_54 = arith.constant dense<0.000000e+00> : vector<16x32xf32>
    %95 = tpu.matmul %94, %7, %cst_54 {dimension_numbers = #tpu.dot_dimension_numbers<[1], [0], [0], [1], [0, 0, 1, 1], [], []>} : vector<16x32xf32>, vector<32x32xf32>, vector<16x32xf32> -> vector<16x32xf32>
    %96 = vector.broadcast %9 : vector<1x32xf32> to vector<16x32xf32>
    %97 = arith.addf %95, %96 : vector<16x32xf32>
    %98 = arith.addf %1, %97 : vector<16x32xf32>
    %cst_55 = arith.constant dense<0.000000e+00> : vector<16xf32>
    %99 = vector.multi_reduction <add>, %98, %cst_55 [1] : vector<16x32xf32> to vector<16xf32>
    %100 = vector.shape_cast %99 : vector<16xf32> to vector<16x1xf32>
    %cst_56 = arith.constant 3.200000e+01 : f32
    %101 = vector.broadcast %cst_56 : f32 to vector<16x1xf32>
    %102 = arith.divf %100, %101 : vector<16x1xf32>
    %103 = vector.broadcast %102 : vector<16x1xf32> to vector<16x32xf32>
    %104 = arith.subf %98, %103 : vector<16x32xf32>
    %105 = arith.mulf %104, %104 : vector<16x32xf32>
    %cst_57 = arith.constant dense<0.000000e+00> : vector<16xf32>
    %106 = vector.multi_reduction <add>, %105, %cst_57 [1] : vector<16x32xf32> to vector<16xf32>
    %107 = vector.shape_cast %106 : vector<16xf32> to vector<16x1xf32>
    %cst_58 = arith.constant 3.200000e+01 : f32
    %108 = vector.broadcast %cst_58 : f32 to vector<16x1xf32>
    %109 = arith.divf %107, %108 : vector<16x1xf32>
    %110 = vector.broadcast %102 : vector<16x1xf32> to vector<16x32xf32>
    %111 = arith.subf %98, %110 : vector<16x32xf32>
    %cst_59 = arith.constant 9.99999974E-6 : f32
    %112 = vector.broadcast %cst_59 : f32 to vector<16x1xf32>
    %113 = arith.addf %109, %112 : vector<16x1xf32>
    %114 = math.rsqrt %113 : vector<16x1xf32>
    %115 = vector.broadcast %114 : vector<16x1xf32> to vector<16x32xf32>
    %116 = arith.mulf %111, %115 : vector<16x32xf32>
    %117 = vector.broadcast %19 : vector<1x32xf32> to vector<16x32xf32>
    %118 = arith.mulf %116, %117 : vector<16x32xf32>
    %119 = vector.broadcast %21 : vector<1x32xf32> to vector<16x32xf32>
    %120 = arith.addf %118, %119 : vector<16x32xf32>
    %cst_60 = arith.constant dense<0.000000e+00> : vector<16x64xf32>
    %121 = tpu.matmul %120, %11, %cst_60 {dimension_numbers = #tpu.dot_dimension_numbers<[1], [0], [0], [1], [0, 0, 1, 1], [], []>} : vector<16x32xf32>, vector<32x64xf32>, vector<16x64xf32> -> vector<16x64xf32>
    %122 = vector.broadcast %13 : vector<1x64xf32> to vector<16x64xf32>
    %123 = arith.addf %121, %122 : vector<16x64xf32>
    %cst_61 = arith.constant 0.000000e+00 : f32
    %124 = vector.broadcast %cst_61 : f32 to vector<16x64xf32>
    %125 = arith.maximumf %123, %124 : vector<16x64xf32>
    %cst_62 = arith.constant dense<0.000000e+00> : vector<16x32xf32>
    %126 = tpu.matmul %125, %15, %cst_62 {dimension_numbers = #tpu.dot_dimension_numbers<[1], [0], [0], [1], [0, 0, 1, 1], [], []>} : vector<16x64xf32>, vector<64x32xf32>, vector<16x32xf32> -> vector<16x32xf32>
    %127 = vector.broadcast %17 : vector<1x32xf32> to vector<16x32xf32>
    %128 = arith.addf %126, %127 : vector<16x32xf32>
    %129 = arith.addf %120, %128 : vector<16x32xf32>
    %cst_63 = arith.constant dense<0.000000e+00> : vector<16xf32>
    %130 = vector.multi_reduction <add>, %129, %cst_63 [1] : vector<16x32xf32> to vector<16xf32>
    %131 = vector.shape_cast %130 : vector<16xf32> to vector<16x1xf32>
    %cst_64 = arith.constant 3.200000e+01 : f32
    %132 = vector.broadcast %cst_64 : f32 to vector<16x1xf32>
    %133 = arith.divf %131, %132 : vector<16x1xf32>
    %134 = vector.broadcast %133 : vector<16x1xf32> to vector<16x32xf32>
    %135 = arith.subf %129, %134 : vector<16x32xf32>
    %136 = arith.mulf %135, %135 : vector<16x32xf32>
    %cst_65 = arith.constant dense<0.000000e+00> : vector<16xf32>
    %137 = vector.multi_reduction <add>, %136, %cst_65 [1] : vector<16x32xf32> to vector<16xf32>
    %138 = vector.shape_cast %137 : vector<16xf32> to vector<16x1xf32>
    %cst_66 = arith.constant 3.200000e+01 : f32
    %139 = vector.broadcast %cst_66 : f32 to vector<16x1xf32>
    %140 = arith.divf %138, %139 : vector<16x1xf32>
    %141 = vector.broadcast %133 : vector<16x1xf32> to vector<16x32xf32>
    %142 = arith.subf %129, %141 : vector<16x32xf32>
    %cst_67 = arith.constant 9.99999974E-6 : f32
    %143 = vector.broadcast %cst_67 : f32 to vector<16x1xf32>
    %144 = arith.addf %140, %143 : vector<16x1xf32>
    %145 = math.rsqrt %144 : vector<16x1xf32>
    %146 = vector.broadcast %145 : vector<16x1xf32> to vector<16x32xf32>
    %147 = arith.mulf %142, %146 : vector<16x32xf32>
    %148 = vector.broadcast %23 : vector<1x32xf32> to vector<16x32xf32>
    %149 = arith.mulf %147, %148 : vector<16x32xf32>
    %150 = vector.broadcast %25 : vector<1x32xf32> to vector<16x32xf32>
    %151 = arith.addf %149, %150 : vector<16x32xf32>
    %c1 = arith.constant 1 : index
    %c0_68 = arith.constant 0 : index
    %c0_69 = arith.constant 0 : index
    %152 = vector.load %arg1[%c1, %c0_68, %c0_69] : memref<2x32x96xf32, #tpu.memory_space<vmem>>, vector<1x32x96xf32>
    %153 = vector.shape_cast %152 : vector<1x32x96xf32> to vector<32x96xf32>
    %c1_70 = arith.constant 1 : index
    %c0_71 = arith.constant 0 : index
    %c0_72 = arith.constant 0 : index
    %154 = vector.load %arg2[%c1_70, %c0_71, %c0_72] : memref<2x1x96xf32, #tpu.memory_space<vmem>>, vector<1x1x96xf32>
    %155 = vector.shape_cast %154 : vector<1x1x96xf32> to vector<1x96xf32>
    %c1_73 = arith.constant 1 : index
    %c0_74 = arith.constant 0 : index
    %c0_75 = arith.constant 0 : index
    %156 = vector.load %arg3[%c1_73, %c0_74, %c0_75] : memref<2x32x32xf32, #tpu.memory_space<vmem>>, vector<1x32x32xf32>
    %157 = vector.shape_cast %156 : vector<1x32x32xf32> to vector<32x32xf32>
    %c1_76 = arith.constant 1 : index
    %c0_77 = arith.constant 0 : index
    %c0_78 = arith.constant 0 : index
    %158 = vector.load %arg4[%c1_76, %c0_77, %c0_78] : memref<2x1x32xf32, #tpu.memory_space<vmem>>, vector<1x1x32xf32>
    %159 = vector.shape_cast %158 : vector<1x1x32xf32> to vector<1x32xf32>
    %c1_79 = arith.constant 1 : index
    %c0_80 = arith.constant 0 : index
    %c0_81 = arith.constant 0 : index
    %160 = vector.load %arg5[%c1_79, %c0_80, %c0_81] : memref<2x32x64xf32, #tpu.memory_space<vmem>>, vector<1x32x64xf32>
    %161 = vector.shape_cast %160 : vector<1x32x64xf32> to vector<32x64xf32>
    %c1_82 = arith.constant 1 : index
    %c0_83 = arith.constant 0 : index
    %c0_84 = arith.constant 0 : index
    %162 = vector.load %arg6[%c1_82, %c0_83, %c0_84] : memref<2x1x64xf32, #tpu.memory_space<vmem>>, vector<1x1x64xf32>
    %163 = vector.shape_cast %162 : vector<1x1x64xf32> to vector<1x64xf32>
    %c1_85 = arith.constant 1 : index
    %c0_86 = arith.constant 0 : index
    %c0_87 = arith.constant 0 : index
    %164 = vector.load %arg7[%c1_85, %c0_86, %c0_87] : memref<2x64x32xf32, #tpu.memory_space<vmem>>, vector<1x64x32xf32>
    %165 = vector.shape_cast %164 : vector<1x64x32xf32> to vector<64x32xf32>
    %c1_88 = arith.constant 1 : index
    %c0_89 = arith.constant 0 : index
    %c0_90 = arith.constant 0 : index
    %166 = vector.load %arg8[%c1_88, %c0_89, %c0_90] : memref<2x1x32xf32, #tpu.memory_space<vmem>>, vector<1x1x32xf32>
    %167 = vector.shape_cast %166 : vector<1x1x32xf32> to vector<1x32xf32>
    %c1_91 = arith.constant 1 : index
    %c0_92 = arith.constant 0 : index
    %c0_93 = arith.constant 0 : index
    %168 = vector.load %arg9[%c1_91, %c0_92, %c0_93] : memref<2x1x32xf32, #tpu.memory_space<vmem>>, vector<1x1x32xf32>
    %169 = vector.shape_cast %168 : vector<1x1x32xf32> to vector<1x32xf32>
    %c1_94 = arith.constant 1 : index
    %c0_95 = arith.constant 0 : index
    %c0_96 = arith.constant 0 : index
    %170 = vector.load %arg10[%c1_94, %c0_95, %c0_96] : memref<2x1x32xf32, #tpu.memory_space<vmem>>, vector<1x1x32xf32>
    %171 = vector.shape_cast %170 : vector<1x1x32xf32> to vector<1x32xf32>
    %c1_97 = arith.constant 1 : index
    %c0_98 = arith.constant 0 : index
    %c0_99 = arith.constant 0 : index
    %172 = vector.load %arg11[%c1_97, %c0_98, %c0_99] : memref<2x1x32xf32, #tpu.memory_space<vmem>>, vector<1x1x32xf32>
    %173 = vector.shape_cast %172 : vector<1x1x32xf32> to vector<1x32xf32>
    %c1_100 = arith.constant 1 : index
    %c0_101 = arith.constant 0 : index
    %c0_102 = arith.constant 0 : index
    %174 = vector.load %arg12[%c1_100, %c0_101, %c0_102] : memref<2x1x32xf32, #tpu.memory_space<vmem>>, vector<1x1x32xf32>
    %175 = vector.shape_cast %174 : vector<1x1x32xf32> to vector<1x32xf32>
    %cst_103 = arith.constant dense<0.000000e+00> : vector<16x96xf32>
    %176 = tpu.matmul %151, %153, %cst_103 {dimension_numbers = #tpu.dot_dimension_numbers<[1], [0], [0], [1], [0, 0, 1, 1], [], []>} : vector<16x32xf32>, vector<32x96xf32>, vector<16x96xf32> -> vector<16x96xf32>
    %177 = vector.broadcast %155 : vector<1x96xf32> to vector<16x96xf32>
    %178 = arith.addf %176, %177 : vector<16x96xf32>
    %179 = vector.shape_cast %178 : vector<16x96xf32> to vector<2x8x96xf32>
    %180 = vector.extract_strided_slice %179 {offsets = [0, 0, 0], sizes = [2, 8, 32], strides = [1, 1, 1]} : vector<2x8x96xf32> to vector<2x8x32xf32>
    %181 = vector.extract_strided_slice %179 {offsets = [0, 0, 32], sizes = [2, 8, 32], strides = [1, 1, 1]} : vector<2x8x96xf32> to vector<2x8x32xf32>
    %182 = vector.extract_strided_slice %179 {offsets = [0, 0, 64], sizes = [2, 8, 32], strides = [1, 1, 1]} : vector<2x8x96xf32> to vector<2x8x32xf32>
    %183 = vector.extract_strided_slice %180 {offsets = [0, 0, 0], sizes = [2, 8, 8], strides = [1, 1, 1]} : vector<2x8x32xf32> to vector<2x8x8xf32>
    %184 = vector.extract_strided_slice %181 {offsets = [0, 0, 0], sizes = [2, 8, 8], strides = [1, 1, 1]} : vector<2x8x32xf32> to vector<2x8x8xf32>
    "tpu.trace_start"() <{level = 10 : i32, message = "bqd,bkd->bqk"}> : () -> ()
    %cst_104 = arith.constant dense<0.000000e+00> : vector<2x8x8xf32>
    %185 = tpu.matmul %183, %184, %cst_104 {dimension_numbers = #tpu.dot_dimension_numbers<[2], [2], [1], [1], [0, 0, 0, 1, 1, 1], [0], [0]>} : vector<2x8x8xf32>, vector<2x8x8xf32>, vector<2x8x8xf32> -> vector<2x8x8xf32>
    "tpu.trace_stop"() : () -> ()
    %cst_105 = arith.constant dense<0xFF800000> : vector<2x8xf32>
    %186 = vector.multi_reduction <maximumf>, %185, %cst_105 [2] : vector<2x8x8xf32> to vector<2x8xf32>
    %187 = vector.shape_cast %186 : vector<2x8xf32> to vector<2x8x1xf32>
    %188 = vector.broadcast %187 : vector<2x8x1xf32> to vector<2x8x8xf32>
    %189 = arith.subf %185, %188 : vector<2x8x8xf32>
    %190 = math.exp %189 : vector<2x8x8xf32>
    %cst_106 = arith.constant dense<0.000000e+00> : vector<2x8xf32>
    %191 = vector.multi_reduction <add>, %190, %cst_106 [2] : vector<2x8x8xf32> to vector<2x8xf32>
    %192 = vector.shape_cast %191 : vector<2x8xf32> to vector<2x8x1xf32>
    %193 = tpu.reciprocal %192 {approx = true} : vector<2x8x1xf32> -> vector<2x8x1xf32>
    %194 = vector.broadcast %193 : vector<2x8x1xf32> to vector<2x8x8xf32>
    %195 = arith.mulf %190, %194 : vector<2x8x8xf32>
    %196 = vector.extract_strided_slice %182 {offsets = [0, 0, 0], sizes = [2, 8, 8], strides = [1, 1, 1]} : vector<2x8x32xf32> to vector<2x8x8xf32>
    "tpu.trace_start"() <{level = 10 : i32, message = "bqk,bkd->bqd"}> : () -> ()
    %cst_107 = arith.constant dense<0.000000e+00> : vector<2x8x8xf32>
    %197 = tpu.matmul %195, %196, %cst_107 {dimension_numbers = #tpu.dot_dimension_numbers<[2], [1], [1], [2], [0, 0, 0, 1, 1, 2], [0], [0]>} : vector<2x8x8xf32>, vector<2x8x8xf32>, vector<2x8x8xf32> -> vector<2x8x8xf32>
    "tpu.trace_stop"() : () -> ()
    %198 = vector.extract_strided_slice %180 {offsets = [0, 0, 8], sizes = [2, 8, 8], strides = [1, 1, 1]} : vector<2x8x32xf32> to vector<2x8x8xf32>
    %199 = vector.extract_strided_slice %181 {offsets = [0, 0, 8], sizes = [2, 8, 8], strides = [1, 1, 1]} : vector<2x8x32xf32> to vector<2x8x8xf32>
    "tpu.trace_start"() <{level = 10 : i32, message = "bqd,bkd->bqk"}> : () -> ()
    %cst_108 = arith.constant dense<0.000000e+00> : vector<2x8x8xf32>
    %200 = tpu.matmul %198, %199, %cst_108 {dimension_numbers = #tpu.dot_dimension_numbers<[2], [2], [1], [1], [0, 0, 0, 1, 1, 1], [0], [0]>} : vector<2x8x8xf32>, vector<2x8x8xf32>, vector<2x8x8xf32> -> vector<2x8x8xf32>
    "tpu.trace_stop"() : () -> ()
    %cst_109 = arith.constant dense<0xFF800000> : vector<2x8xf32>
    %201 = vector.multi_reduction <maximumf>, %200, %cst_109 [2] : vector<2x8x8xf32> to vector<2x8xf32>
    %202 = vector.shape_cast %201 : vector<2x8xf32> to vector<2x8x1xf32>
    %203 = vector.broadcast %202 : vector<2x8x1xf32> to vector<2x8x8xf32>
    %204 = arith.subf %200, %203 : vector<2x8x8xf32>
    %205 = math.exp %204 : vector<2x8x8xf32>
    %cst_110 = arith.constant dense<0.000000e+00> : vector<2x8xf32>
    %206 = vector.multi_reduction <add>, %205, %cst_110 [2] : vector<2x8x8xf32> to vector<2x8xf32>
    %207 = vector.shape_cast %206 : vector<2x8xf32> to vector<2x8x1xf32>
    %208 = tpu.reciprocal %207 {approx = true} : vector<2x8x1xf32> -> vector<2x8x1xf32>
    %209 = vector.broadcast %208 : vector<2x8x1xf32> to vector<2x8x8xf32>
    %210 = arith.mulf %205, %209 : vector<2x8x8xf32>
    %211 = vector.extract_strided_slice %182 {offsets = [0, 0, 8], sizes = [2, 8, 8], strides = [1, 1, 1]} : vector<2x8x32xf32> to vector<2x8x8xf32>
    "tpu.trace_start"() <{level = 10 : i32, message = "bqk,bkd->bqd"}> : () -> ()
    %cst_111 = arith.constant dense<0.000000e+00> : vector<2x8x8xf32>
    %212 = tpu.matmul %210, %211, %cst_111 {dimension_numbers = #tpu.dot_dimension_numbers<[2], [1], [1], [2], [0, 0, 0, 1, 1, 2], [0], [0]>} : vector<2x8x8xf32>, vector<2x8x8xf32>, vector<2x8x8xf32> -> vector<2x8x8xf32>
    "tpu.trace_stop"() : () -> ()
    %213 = vector.extract_strided_slice %180 {offsets = [0, 0, 16], sizes = [2, 8, 8], strides = [1, 1, 1]} : vector<2x8x32xf32> to vector<2x8x8xf32>
    %214 = vector.extract_strided_slice %181 {offsets = [0, 0, 16], sizes = [2, 8, 8], strides = [1, 1, 1]} : vector<2x8x32xf32> to vector<2x8x8xf32>
    "tpu.trace_start"() <{level = 10 : i32, message = "bqd,bkd->bqk"}> : () -> ()
    %cst_112 = arith.constant dense<0.000000e+00> : vector<2x8x8xf32>
    %215 = tpu.matmul %213, %214, %cst_112 {dimension_numbers = #tpu.dot_dimension_numbers<[2], [2], [1], [1], [0, 0, 0, 1, 1, 1], [0], [0]>} : vector<2x8x8xf32>, vector<2x8x8xf32>, vector<2x8x8xf32> -> vector<2x8x8xf32>
    "tpu.trace_stop"() : () -> ()
    %cst_113 = arith.constant dense<0xFF800000> : vector<2x8xf32>
    %216 = vector.multi_reduction <maximumf>, %215, %cst_113 [2] : vector<2x8x8xf32> to vector<2x8xf32>
    %217 = vector.shape_cast %216 : vector<2x8xf32> to vector<2x8x1xf32>
    %218 = vector.broadcast %217 : vector<2x8x1xf32> to vector<2x8x8xf32>
    %219 = arith.subf %215, %218 : vector<2x8x8xf32>
    %220 = math.exp %219 : vector<2x8x8xf32>
    %cst_114 = arith.constant dense<0.000000e+00> : vector<2x8xf32>
    %221 = vector.multi_reduction <add>, %220, %cst_114 [2] : vector<2x8x8xf32> to vector<2x8xf32>
    %222 = vector.shape_cast %221 : vector<2x8xf32> to vector<2x8x1xf32>
    %223 = tpu.reciprocal %222 {approx = true} : vector<2x8x1xf32> -> vector<2x8x1xf32>
    %224 = vector.broadcast %223 : vector<2x8x1xf32> to vector<2x8x8xf32>
    %225 = arith.mulf %220, %224 : vector<2x8x8xf32>
    %226 = vector.extract_strided_slice %182 {offsets = [0, 0, 16], sizes = [2, 8, 8], strides = [1, 1, 1]} : vector<2x8x32xf32> to vector<2x8x8xf32>
    "tpu.trace_start"() <{level = 10 : i32, message = "bqk,bkd->bqd"}> : () -> ()
    %cst_115 = arith.constant dense<0.000000e+00> : vector<2x8x8xf32>
    %227 = tpu.matmul %225, %226, %cst_115 {dimension_numbers = #tpu.dot_dimension_numbers<[2], [1], [1], [2], [0, 0, 0, 1, 1, 2], [0], [0]>} : vector<2x8x8xf32>, vector<2x8x8xf32>, vector<2x8x8xf32> -> vector<2x8x8xf32>
    "tpu.trace_stop"() : () -> ()
    %228 = vector.extract_strided_slice %180 {offsets = [0, 0, 24], sizes = [2, 8, 8], strides = [1, 1, 1]} : vector<2x8x32xf32> to vector<2x8x8xf32>
    %229 = vector.extract_strided_slice %181 {offsets = [0, 0, 24], sizes = [2, 8, 8], strides = [1, 1, 1]} : vector<2x8x32xf32> to vector<2x8x8xf32>
    "tpu.trace_start"() <{level = 10 : i32, message = "bqd,bkd->bqk"}> : () -> ()
    %cst_116 = arith.constant dense<0.000000e+00> : vector<2x8x8xf32>
    %230 = tpu.matmul %228, %229, %cst_116 {dimension_numbers = #tpu.dot_dimension_numbers<[2], [2], [1], [1], [0, 0, 0, 1, 1, 1], [0], [0]>} : vector<2x8x8xf32>, vector<2x8x8xf32>, vector<2x8x8xf32> -> vector<2x8x8xf32>
    "tpu.trace_stop"() : () -> ()
    %cst_117 = arith.constant dense<0xFF800000> : vector<2x8xf32>
    %231 = vector.multi_reduction <maximumf>, %230, %cst_117 [2] : vector<2x8x8xf32> to vector<2x8xf32>
    %232 = vector.shape_cast %231 : vector<2x8xf32> to vector<2x8x1xf32>
    %233 = vector.broadcast %232 : vector<2x8x1xf32> to vector<2x8x8xf32>
    %234 = arith.subf %230, %233 : vector<2x8x8xf32>
    %235 = math.exp %234 : vector<2x8x8xf32>
    %cst_118 = arith.constant dense<0.000000e+00> : vector<2x8xf32>
    %236 = vector.multi_reduction <add>, %235, %cst_118 [2] : vector<2x8x8xf32> to vector<2x8xf32>
    %237 = vector.shape_cast %236 : vector<2x8xf32> to vector<2x8x1xf32>
    %238 = tpu.reciprocal %237 {approx = true} : vector<2x8x1xf32> -> vector<2x8x1xf32>
    %239 = vector.broadcast %238 : vector<2x8x1xf32> to vector<2x8x8xf32>
    %240 = arith.mulf %235, %239 : vector<2x8x8xf32>
    %241 = vector.extract_strided_slice %182 {offsets = [0, 0, 24], sizes = [2, 8, 8], strides = [1, 1, 1]} : vector<2x8x32xf32> to vector<2x8x8xf32>
    "tpu.trace_start"() <{level = 10 : i32, message = "bqk,bkd->bqd"}> : () -> ()
    %cst_119 = arith.constant dense<0.000000e+00> : vector<2x8x8xf32>
    %242 = tpu.matmul %240, %241, %cst_119 {dimension_numbers = #tpu.dot_dimension_numbers<[2], [1], [1], [2], [0, 0, 0, 1, 1, 2], [0], [0]>} : vector<2x8x8xf32>, vector<2x8x8xf32>, vector<2x8x8xf32> -> vector<2x8x8xf32>
    "tpu.trace_stop"() : () -> ()
    %243 = tpu.concatenate %197, %212, %227, %242 in 2 : vector<2x8x8xf32>, vector<2x8x8xf32>, vector<2x8x8xf32>, vector<2x8x8xf32> -> vector<2x8x32xf32>
    %244 = vector.shape_cast %243 : vector<2x8x32xf32> to vector<16x32xf32>
    %cst_120 = arith.constant dense<0.000000e+00> : vector<16x32xf32>
    %245 = tpu.matmul %244, %157, %cst_120 {dimension_numbers = #tpu.dot_dimension_numbers<[1], [0], [0], [1], [0, 0, 1, 1], [], []>} : vector<16x32xf32>, vector<32x32xf32>, vector<16x32xf32> -> vector<16x32xf32>
    %246 = vector.broadcast %159 : vector<1x32xf32> to vector<16x32xf32>
    %247 = arith.addf %245, %246 : vector<16x32xf32>
    %248 = arith.addf %151, %247 : vector<16x32xf32>
    %cst_121 = arith.constant dense<0.000000e+00> : vector<16xf32>
    %249 = vector.multi_reduction <add>, %248, %cst_121 [1] : vector<16x32xf32> to vector<16xf32>
    %250 = vector.shape_cast %249 : vector<16xf32> to vector<16x1xf32>
    %cst_122 = arith.constant 3.200000e+01 : f32
    %251 = vector.broadcast %cst_122 : f32 to vector<16x1xf32>
    %252 = arith.divf %250, %251 : vector<16x1xf32>
    %253 = vector.broadcast %252 : vector<16x1xf32> to vector<16x32xf32>
    %254 = arith.subf %248, %253 : vector<16x32xf32>
    %255 = arith.mulf %254, %254 : vector<16x32xf32>
    %cst_123 = arith.constant dense<0.000000e+00> : vector<16xf32>
    %256 = vector.multi_reduction <add>, %255, %cst_123 [1] : vector<16x32xf32> to vector<16xf32>
    %257 = vector.shape_cast %256 : vector<16xf32> to vector<16x1xf32>
    %cst_124 = arith.constant 3.200000e+01 : f32
    %258 = vector.broadcast %cst_124 : f32 to vector<16x1xf32>
    %259 = arith.divf %257, %258 : vector<16x1xf32>
    %260 = vector.broadcast %252 : vector<16x1xf32> to vector<16x32xf32>
    %261 = arith.subf %248, %260 : vector<16x32xf32>
    %cst_125 = arith.constant 9.99999974E-6 : f32
    %262 = vector.broadcast %cst_125 : f32 to vector<16x1xf32>
    %263 = arith.addf %259, %262 : vector<16x1xf32>
    %264 = math.rsqrt %263 : vector<16x1xf32>
    %265 = vector.broadcast %264 : vector<16x1xf32> to vector<16x32xf32>
    %266 = arith.mulf %261, %265 : vector<16x32xf32>
    %267 = vector.broadcast %169 : vector<1x32xf32> to vector<16x32xf32>
    %268 = arith.mulf %266, %267 : vector<16x32xf32>
    %269 = vector.broadcast %171 : vector<1x32xf32> to vector<16x32xf32>
    %270 = arith.addf %268, %269 : vector<16x32xf32>
    %cst_126 = arith.constant dense<0.000000e+00> : vector<16x64xf32>
    %271 = tpu.matmul %270, %161, %cst_126 {dimension_numbers = #tpu.dot_dimension_numbers<[1], [0], [0], [1], [0, 0, 1, 1], [], []>} : vector<16x32xf32>, vector<32x64xf32>, vector<16x64xf32> -> vector<16x64xf32>
    %272 = vector.broadcast %163 : vector<1x64xf32> to vector<16x64xf32>
    %273 = arith.addf %271, %272 : vector<16x64xf32>
    %cst_127 = arith.constant 0.000000e+00 : f32
    %274 = vector.broadcast %cst_127 : f32 to vector<16x64xf32>
    %275 = arith.maximumf %273, %274 : vector<16x64xf32>
    %cst_128 = arith.constant dense<0.000000e+00> : vector<16x32xf32>
    %276 = tpu.matmul %275, %165, %cst_128 {dimension_numbers = #tpu.dot_dimension_numbers<[1], [0], [0], [1], [0, 0, 1, 1], [], []>} : vector<16x64xf32>, vector<64x32xf32>, vector<16x32xf32> -> vector<16x32xf32>
    %277 = vector.broadcast %167 : vector<1x32xf32> to vector<16x32xf32>
    %278 = arith.addf %276, %277 : vector<16x32xf32>
    %279 = arith.addf %270, %278 : vector<16x32xf32>
    %cst_129 = arith.constant dense<0.000000e+00> : vector<16xf32>
    %280 = vector.multi_reduction <add>, %279, %cst_129 [1] : vector<16x32xf32> to vector<16xf32>
    %281 = vector.shape_cast %280 : vector<16xf32> to vector<16x1xf32>
    %cst_130 = arith.constant 3.200000e+01 : f32
    %282 = vector.broadcast %cst_130 : f32 to vector<16x1xf32>
    %283 = arith.divf %281, %282 : vector<16x1xf32>
    %284 = vector.broadcast %283 : vector<16x1xf32> to vector<16x32xf32>
    %285 = arith.subf %279, %284 : vector<16x32xf32>
    %286 = arith.mulf %285, %285 : vector<16x32xf32>
    %cst_131 = arith.constant dense<0.000000e+00> : vector<16xf32>
    %287 = vector.multi_reduction <add>, %286, %cst_131 [1] : vector<16x32xf32> to vector<16xf32>
    %288 = vector.shape_cast %287 : vector<16xf32> to vector<16x1xf32>
    %cst_132 = arith.constant 3.200000e+01 : f32
    %289 = vector.broadcast %cst_132 : f32 to vector<16x1xf32>
    %290 = arith.divf %288, %289 : vector<16x1xf32>
    %291 = vector.broadcast %283 : vector<16x1xf32> to vector<16x32xf32>
    %292 = arith.subf %279, %291 : vector<16x32xf32>
    %cst_133 = arith.constant 9.99999974E-6 : f32
    %293 = vector.broadcast %cst_133 : f32 to vector<16x1xf32>
    %294 = arith.addf %290, %293 : vector<16x1xf32>
    %295 = math.rsqrt %294 : vector<16x1xf32>
    %296 = vector.broadcast %295 : vector<16x1xf32> to vector<16x32xf32>
    %297 = arith.mulf %292, %296 : vector<16x32xf32>
    %298 = vector.broadcast %173 : vector<1x32xf32> to vector<16x32xf32>
    %299 = arith.mulf %297, %298 : vector<16x32xf32>
    %300 = vector.broadcast %175 : vector<1x32xf32> to vector<16x32xf32>
    %301 = arith.addf %299, %300 : vector<16x32xf32>
    %302 = vector.shape_cast %301 : vector<16x32xf32> to vector<2x8x32xf32>
    %c0_134 = arith.constant 0 : index
    %c0_135 = arith.constant 0 : index
    %c0_136 = arith.constant 0 : index
    %303 = vector.load %arg13[%c0_134, %c0_135, %c0_136] : memref<2x8x32xf32, #tpu.memory_space<vmem>>, vector<2x8x32xf32>
    tpu.vector_store %arg13[%c0_134, %c0_135, %c0_136], %302 {strides = array<i32>} : memref<2x8x32xf32, #tpu.memory_space<vmem>>, vector<2x8x32xf32>,
    return
  }
}

</mosaic_0001>

<bundles_post_ra>
// kernel: transformer_encoder.1
= control target key start
LH: loop header
LB: loop body
LE: loop exit
PB: predicated region body
PF: predicated region fallthrough
CT: control target
= control target key end

     0   :  { %vm80_vm0 = vcmask 261120   ;;  %v4286_v6 = vmov 0.0   ;;  %vm4287_vm1 = vmmov 0   ;;  %s4288_s21 = smov 96   ;;  %vm165_vm2 = vcmask 64512   ;;  %s4289_s22 = smov 64   ;;  %s4926_s1 = inlined_call_operand.vmem [shape: f32[2,32,96], index: 1, kind: input, shape index: {}]   ;;  %s4927_s0 = inlined_call_operand.vmem [shape: f32[2,8,32], index: 0, kind: input, shape index: {}]   ;;  %s4928_s2 = inlined_call_operand.vmem [shape: f32[2,1,96], index: 2, kind: input, shape index: {}]   ;;  %s4929_s3 = inlined_call_operand.vmem [shape: f32[2,32,32], index: 3, kind: input, shape index: {}]   ;;  %s4930_s4 = inlined_call_operand.vmem [shape: f32[2,1,32], index: 4, kind: input, shape index: {}]   ;;  %s4931_s5 = inlined_call_operand.vmem [shape: f32[2,32,64], index: 5, kind: input, shape index: {}]   ;;  %s4932_s7 = inlined_call_operand.vmem [shape: f32[2,64,32], index: 7, kind: input, shape index: {}]   ;;  %s4933_s9 = inlined_call_operand.vmem [shape: f32[2,1,32], index: 9, kind: input, shape index: {}]   ;;  %s4934_s10 = inlined_call_operand.vmem [shape: f32[2,1,32], index: 10, kind: input, shape index: {}]   ;;  %s4935_s6 = inlined_call_operand.vmem [shape: f32[2,1,64], index: 6, kind: input, shape index: {}]   ;;  %s4936_s8 = inlined_call_operand.vmem [shape: f32[2,1,32], index: 8, kind: input, shape index: {}]   ;;  %s4937_s11 = inlined_call_operand.vmem [shape: f32[2,1,32], index: 11, kind: input, shape index: {}]   ;;  %s4938_s12 = inlined_call_operand.vmem [shape: f32[2,1,32], index: 12, kind: input, shape index: {}]   ;;  %s4939_s13 = inlined_call_operand.vmem [shape: f32[2,8,32], index: 13, kind: output, shape index: {}]  }
   0x1   :  { %v49_v0 = vld [vmem:[%s4926_s1 + $0x18] sm:$0xff]  ;;  %v48_v1 = vld [vmem:[%s4926_s1 + $0x10] sm:$0xff]  ;;  %v4381_v2 = vld [vmem:[%s4927_s0] sm:$0xff]  ;;  %3947 = vmatprep.subr.mxu0 %v4286_v6  ;;  %3949 = vmatprep.mubr.msk.f32.mxu0 %vm4287_vm1, %v4286_v6  ;;  %s4290_s23 = smov 88   ;;  %s4291_s24 = smov 120   ;;  %vm1510_vm3 = vcmask 195584  }
   0x2   :  { %3926 = vmatprep.subr.mxu1 %v49_v0  ;;  %v47_v3 = vld [vmem:[%s4926_s1 + $0x8] sm:$0xff]  ;;  %3934 = vmatprep.mubr.msk.f32.mxu1 %vm80_vm0, %v4381_v2  ;;  %v46_v4 = vld [vmem:[%s4926_s1] sm:$0xff]  ;;  %s4292_s25 = smov 56   ;;  %s4293_s26 = smov 80   ;;  %vm1507_vm4 = vcmask 130048   ;;  %vm1740_vm5 = vcmask 523264  }
   0x3   :  { %3927 = vmatpush3.msra.mxu1 %v49_v0  ;;  %v4394_v5 = vld [vmem:[%s4927_s0 + $0x8] sm:$0xff]  ;;  %v3698_v8 = vld [vmem:[%s4928_s2] ss:$0 sm:$0xff]  ;;  %s4294_s27 = smov 112   ;;  %s4295_s28 = smov 48  }
   0x4   :  { %3928 = vmatprep.subr.mxu1 %v48_v1  ;;  %s4296_s29 = smov 72   ;;  %s4297_s30 = smov 104  }
   0x5   :  { %3929 = vmatpush3.msra.mxu1 %v48_v1  ;;  %s4944_s14 = smov 40   ;;  %s4942_s15 = smov 8  }
   0x6   :  { %3930 = vmatprep.subr.mxu1 %v47_v3  ;;  %s4940_s16 = smov 16   ;;  %s4946_s17 = smov 24  }
   0x7   :  { %3931 = vmatpush3.msra.mxu1 %v47_v3 }
   0x8   :  { %3932 = vmatprep.subr.mxu1 %v46_v4 }
   0x9   :  { %3933 = vmatpush3.msra.mxu1 %v46_v4 }
   0xa   :  { %3935 = vmatmul.mubr.msk.f32.vlgmr.msra.gmra.mxu1 %vm80_vm0, %v4394_v5  ;;  %3937 = vmatprep.subr.mxu1 %v4286_v6 }
   0xb   :  { %3939 = vmatprep.mubr.msk.f32.mxu1 %vm4287_vm1, %v4286_v6 }
  0xca   :  { %v3936_v7 = vpop.f32.mrf.mxu1 }
  0xcb   :  { %v4411_v11 = vadd.f32 %v3936_v7, %v3698_v8 }
  0xcc   :  { %v153_v9 = vpop.f32.mrf.mxu1 }
  0xcd   :  { %v4407_v10 = vadd.f32 %v3698_v8, %v153_v9 }
  0xcf   :  { %163 = vrot.lane.b32.xlu0 %v4407_v10, %s4288_s21 }
  0xd3   :  { %241 = vrot.lane.b32.xlu0 %v4411_v11, %s4288_s21 }
 0x141   :  { %v164_v12 = vpop.permute.xlu0 %163 }
 0x142   :  { %3938 = vmatpush3.xpose.msk.msra.mxu1 %vm165_vm2, %v164_v12 }
 0x143   :  { %3942 = vmatprep.subr.mxu1 %v4286_v6 }
 0x145   :  { %3940 = vmatmul.mubr.msk.f32.vlgmr.msra.gmra.mxu1 %vm165_vm2, %v4407_v10  ;;  %v242_v13 = vpop.permute.xlu0 %241 }
 0x146   :  { %3943 = vmatpush3.xpose.msk.msra.mxu1 %vm165_vm2, %v242_v13  ;;  %3944 = vmatprep.mubr.msk.f32.mxu1 %vm4287_vm1, %v4286_v6 }
 0x147   :  { %3952 = vmatprep.subr.mxu1 %v4286_v6 }
 0x149   :  { %3945 = vmatmul.mubr.msk.f32.vlgmr.msra.gmra.mxu1 %vm165_vm2, %v4411_v11 }
 0x14a   :  { %3954 = vmatprep.mubr.msk.f32.mxu1 %vm4287_vm1, %v4286_v6 }
 0x205   :  { %v236_v14 = vpop.f32.mrf.mxu1 }
 0x206   :  { %v317_v15 = vsel %vm165_vm2, %v236_v14, -inf }
 0x207   :  { %318 = vmax.xlane.f32.xlu1 %v317_v15  ;;  %v3941_v16 = vpop.f32.mrf.mxu1 }
 0x209   :  { %v313_v17 = vpop.f32.mrf.mxu1 }
 0x20a   :  { %v320_v18 = vsel %vm165_vm2, %v313_v17, -inf }
 0x20b   :  { %321 = vmax.xlane.f32.xlu1 %v320_v18  ;;  %v3946_v19 = vpop.f32.mrf.mxu1 }
 0x21c   :  { %339 = vrot.lane.b32.xlu1 %v4407_v10, %s4289_s22 }
 0x220   :  { %415 = vrot.lane.b32.xlu1 %v4411_v11, %s4289_s22 }
 0x224   :  { %493 = vrot.lane.b32.xlu1 %v4407_v10, %s4290_s23 }
 0x228   :  { %571 = vrot.lane.b32.xlu1 %v4411_v11, %s4290_s23 }
 0x290   :  { %v319_v20 = vpop.xlane.xlu1 %318 }
 0x291   :  { %v323_v21 = vsub.f32 %v236_v14, %v319_v20 }
 0x293   :  { %v325_v22 = vmul.f32 1.442695, %v323_v21 }
 0x294   :  { %v322_v23 = vpop.xlane.xlu1 %321 }
 0x295   :  { %4206 = vpow2.f32 %v325_v22  ;;  %v324_v24 = vsub.f32 %v313_v17, %v322_v23 }
 0x297   :  { %v327_v25 = vmul.f32 1.442695, %v324_v24 }
 0x298   :  { %v340_v26 = vpop.permute.xlu1 %339 }
 0x299   :  { %4208 = vpow2.f32 %v327_v25  ;;  %3948 = vmatpush3.msra.mxu0 %v340_v26 }
 0x29a   :  { %3957 = vmatprep.subr.mxu0 %v4286_v6 }
 0x29c   :  { %v416_v27 = vpop.permute.xlu1 %415 }
 0x29d   :  { %3953 = vmatpush3.msra.mxu1 %v416_v27 }
 0x29e   :  { %3962 = vmatprep.subr.mxu1 %v4286_v6 }
 0x2a0   :  { %v494_v32 = vpop.permute.xlu1 %493 }
 0x2a2   :  { %v4207_v28 = vpop.eup %4206 }
 0x2a3   :  { %v329_v29 = vsel %vm165_vm2, %v4207_v28, 0.0 }
 0x2a4   :  { %330 = vadd.xlane.f32.xlu0 %v329_v29  ;;  %v572_v33 = vpop.permute.xlu1 %571 }
 0x2a6   :  { %v4209_v30 = vpop.eup %4208 }
 0x2a7   :  { %v332_v31 = vsel %vm165_vm2, %v4209_v30, 0.0 }
 0x2a8   :  { %333 = vadd.xlane.f32.xlu1 %v332_v31 }
 0x2b9   :  { %569 = vrot.lane.b32.xlu1 %v4411_v11, %s4291_s24 }
 0x2ba   :  { %491 = vrot.lane.b32.xlu0 %v4407_v10, %s4291_s24 }
 0x32d   :  { %v331_v34 = vpop.xlane.xlu0 %330 }
 0x32e   :  { %4210 = vrcp.f32 %v331_v34 }
 0x331   :  { %v334_v35 = vpop.xlane.xlu1 %333  ;;  %v492_v40 = vpop.permute.xlu0 %491 }
 0x332   :  { %4212 = vrcp.f32 %v334_v35 }
 0x335   :  { %v570_v41 = vpop.permute.xlu1 %569 }
 0x33b   :  { %v4211_v36 = vpop.eup %4210 }
 0x33c   :  { %v337_v37 = vmul.f32 %v4211_v36, %v4207_v28 }
 0x33e   :  { %3950 = vmatmul.mubr.msk.f32.vlgmr.msra.gmra.mxu0 %vm165_vm2, %v337_v37 }
 0x33f   :  { %v4213_v38 = vpop.eup %4212  ;;  %3958 = vmatpush3.xpose.msk.msra.mxu0 %vm165_vm2, %v494_v32  ;;  %3959 = vmatprep.mubr.msk.f32.mxu0 %vm4287_vm1, %v4286_v6 }
 0x340   :  { %v338_v39 = vmul.f32 %v4213_v38, %v4209_v30  ;;  %3967 = vmatprep.subr.mxu0 %v4286_v6 }
 0x342   :  { %3955 = vmatmul.mubr.msk.f32.vlgmr.msra.gmra.mxu1 %vm165_vm2, %v338_v39  ;;  %3960 = vmatmul.mubr.msk.f32.vlgmr.msra.gmra.mxu0 %vm165_vm2, %v492_v40 }
 0x343   :  { %3963 = vmatpush3.xpose.msk.msra.mxu1 %vm165_vm2, %v572_v33  ;;  %3964 = vmatprep.mubr.msk.f32.mxu1 %vm4287_vm1, %v4286_v6 }
 0x344   :  { %3972 = vmatprep.subr.mxu1 %v4286_v6  ;;  %3969 = vmatprep.mubr.msk.f32.mxu0 %vm4287_vm1, %v4286_v6 }
 0x346   :  { %3965 = vmatmul.mubr.msk.f32.vlgmr.msra.gmra.mxu1 %vm165_vm2, %v570_v41 }
 0x347   :  { %3974 = vmatprep.mubr.msk.f32.mxu1 %vm4287_vm1, %v4286_v6 }
 0x3fe   :  { %v4461_v42 = vpop.f32.mrf.mxu0 }
 0x400   :  { %v3951_v43 = vpop.f32.mrf.mxu0 }
 0x402   :  { %v4463_v44 = vpop.f32.mrf.mxu1  ;;  %v565_v45 = vpop.f32.mrf.mxu0 }
 0x403   :  { %v647_v46 = vsel %vm165_vm2, %v565_v45, -inf }
 0x404   :  { %v3956_v47 = vpop.f32.mrf.mxu1  ;;  %648 = vmax.xlane.f32.xlu1 %v647_v46  ;;  %v3961_v48 = vpop.f32.mrf.mxu0 }
 0x406   :  { %v643_v49 = vpop.f32.mrf.mxu1 }
 0x407   :  { %v650_v50 = vsel %vm165_vm2, %v643_v49, -inf }
 0x408   :  { %651 = vmax.xlane.f32.xlu0 %v650_v50  ;;  %v3966_v51 = vpop.f32.mrf.mxu1 }
 0x415   :  { %669 = vrot.lane.b32.xlu1 %v4407_v10, %s4292_s25 }
 0x419   :  { %823 = vrot.lane.b32.xlu1 %v4407_v10, %s4293_s26 }
 0x41d   :  { %901 = vrot.lane.b32.xlu1 %v4411_v11, %s4293_s26 }
 0x41e   :  { %745 = vrot.lane.b32.xlu0 %v4411_v11, %s4292_s25 }
 0x422   :  { %821 = vrot.lane.b32.xlu0 %v4407_v10, %s4294_s27 }
 0x48d   :  { %v649_v52 = vpop.xlane.xlu1 %648 }
 0x48e   :  { %v653_v53 = vsub.f32 %v565_v45, %v649_v52 }
 0x490   :  { %v655_v54 = vmul.f32 1.442695, %v653_v53 }
 0x491   :  { %v670_v55 = vpop.permute.xlu1 %669  ;;  %v652_v56 = vpop.xlane.xlu0 %651 }
 0x492   :  { %4214 = vpow2.f32 %v655_v54  ;;  %v654_v57 = vsub.f32 %v643_v49, %v652_v56  ;;  %3968 = vmatpush3.msra.mxu0 %v670_v55 }
 0x493   :  { %3977 = vmatprep.subr.mxu0 %v4286_v6 }
 0x494   :  { %v657_v58 = vmul.f32 1.442695, %v654_v57 }
 0x495   :  { %v746_v59 = vpop.permute.xlu0 %745  ;;  %v824_v0 = vpop.permute.xlu1 %823 }
 0x496   :  { %4216 = vpow2.f32 %v657_v58  ;;  %3973 = vmatpush3.msra.mxu1 %v746_v59 }
 0x497   :  { %3982 = vmatprep.subr.mxu1 %v4286_v6 }
 0x499   :  { %v902_v1 = vpop.permute.xlu1 %901  ;;  %v822_v13 = vpop.permute.xlu0 %821 }
 0x49f   :  { %v4215_v60 = vpop.eup %4214 }
 0x4a0   :  { %v659_v61 = vsel %vm165_vm2, %v4215_v60, 0.0 }
 0x4a1   :  { %660 = vadd.xlane.f32.xlu1 %v659_v61 }
 0x4a3   :  { %v4217_v62 = vpop.eup %4216 }
 0x4a4   :  { %v662_v63 = vsel %vm165_vm2, %v4217_v62, 0.0 }
 0x4a5   :  { %663 = vadd.xlane.f32.xlu1 %v662_v63 }
 0x4b6   :  { %899 = vrot.lane.b32.xlu1 %v4411_v11, %s4294_s27 }
 0x52a   :  { %v661_v3 = vpop.xlane.xlu1 %660 }
 0x52b   :  { %4218 = vrcp.f32 %v661_v3 }
 0x52e   :  { %v664_v4 = vpop.xlane.xlu1 %663 }
 0x52f   :  { %4220 = vrcp.f32 %v664_v4 }
 0x532   :  { %v900_v14 = vpop.permute.xlu1 %899 }
 0x538   :  { %v4219_v7 = vpop.eup %4218 }
 0x539   :  { %v667_v8 = vmul.f32 %v4219_v7, %v4215_v60 }
 0x53b   :  { %3970 = vmatmul.mubr.msk.f32.vlgmr.msra.gmra.mxu0 %vm165_vm2, %v667_v8 }
 0x53c   :  { %v4221_v9 = vpop.eup %4220  ;;  %3978 = vmatpush3.xpose.msk.msra.mxu0 %vm165_vm2, %v824_v0  ;;  %3979 = vmatprep.mubr.msk.f32.mxu0 %vm4287_vm1, %v4286_v6 }
 0x53d   :  { %v668_v12 = vmul.f32 %v4221_v9, %v4217_v62  ;;  %3987 = vmatprep.subr.mxu0 %v4286_v6 }
 0x53f   :  { %3975 = vmatmul.mubr.msk.f32.vlgmr.msra.gmra.mxu1 %vm165_vm2, %v668_v12  ;;  %3980 = vmatmul.mubr.msk.f32.vlgmr.msra.gmra.mxu0 %vm165_vm2, %v822_v13 }
 0x540   :  { %3983 = vmatpush3.xpose.msk.msra.mxu1 %vm165_vm2, %v902_v1  ;;  %3984 = vmatprep.mubr.msk.f32.mxu1 %vm4287_vm1, %v4286_v6 }
 0x541   :  { %3992 = vmatprep.subr.mxu1 %v4286_v6  ;;  %3989 = vmatprep.mubr.msk.f32.mxu0 %vm4287_vm1, %v4286_v6 }
 0x543   :  { %3985 = vmatmul.mubr.msk.f32.vlgmr.msra.gmra.mxu1 %vm165_vm2, %v900_v14 }
 0x544   :  { %3994 = vmatprep.mubr.msk.f32.mxu1 %vm4287_vm1, %v4286_v6 }
 0x5fb   :  { %v4499_v15 = vpop.f32.mrf.mxu0 }
 0x5fd   :  { %v3971_v16 = vpop.f32.mrf.mxu0 }
 0x5ff   :  { %v4501_v17 = vpop.f32.mrf.mxu1  ;;  %v895_v18 = vpop.f32.mrf.mxu0 }
 0x600   :  { %v977_v19 = vsel %vm165_vm2, %v895_v18, -inf }
 0x601   :  { %v3976_v20 = vpop.f32.mrf.mxu1  ;;  %978 = vmax.xlane.f32.xlu0 %v977_v19  ;;  %v3981_v21 = vpop.f32.mrf.mxu0  ;;  %v51_v19 = vld [vmem:[%s4929_s3] sm:$0xff] }
 0x603   :  { %v973_v22 = vpop.f32.mrf.mxu1 }
 0x604   :  { %v980_v23 = vsel %vm165_vm2, %v973_v22, -inf }
 0x605   :  { %981 = vmax.xlane.f32.xlu1 %v980_v23  ;;  %v3986_v24 = vpop.f32.mrf.mxu1 }
 0x616   :  { %999 = vrot.lane.b32.xlu1 %v4407_v10, %s4295_s28 }
 0x617   :  { %1075 = vrot.lane.b32.xlu0 %v4411_v11, %s4295_s28 }
 0x61a   :  { %1153 = vrot.lane.b32.xlu1 %v4407_v10, %s4296_s29 }
 0x61e   :  { %1231 = vrot.lane.b32.xlu1 %v4411_v11, %s4296_s29 }
 0x622   :  { %1229 = vrot.lane.b32.xlu1 %v4411_v11, %s4297_s30 }
 0x68a   :  { %v979_v25 = vpop.xlane.xlu0 %978 }
 0x68b   :  { %v983_v26 = vsub.f32 %v895_v18, %v979_v25  ;;  %v52_v18 = vld [vmem:[%s4929_s3 + $0x8] sm:$0xff] }
 0x68d   :  { %v985_v27 = vmul.f32 1.442695, %v983_v26 }
 0x68e   :  { %v982_v28 = vpop.xlane.xlu1 %981  ;;  %v1076_v29 = vpop.permute.xlu0 %1075 }
 0x68f   :  { %4222 = vpow2.f32 %v985_v27  ;;  %v984_v30 = vsub.f32 %v973_v22, %v982_v28  ;;  %3993 = vmatpush3.msra.mxu1 %v1076_v29 }
 0x690   :  { %4002 = vmatprep.subr.mxu1 %v4286_v6 }
 0x691   :  { %v987_v31 = vmul.f32 1.442695, %v984_v30 }
 0x692   :  { %v1000_v32 = vpop.permute.xlu1 %999 }
 0x693   :  { %4224 = vpow2.f32 %v987_v31  ;;  %3988 = vmatpush3.msra.mxu0 %v1000_v32 }
 0x694   :  { %3997 = vmatprep.subr.mxu0 %v4286_v6 }
 0x696   :  { %v1154_v39 = vpop.permute.xlu1 %1153 }
 0x69a   :  { %v1232_v45 = vpop.permute.xlu1 %1231 }
 0x69c   :  { %v4223_v33 = vpop.eup %4222 }
 0x69d   :  { %v989_v34 = vsel %vm165_vm2, %v4223_v33, 0.0 }
 0x69e   :  { %990 = vadd.xlane.f32.xlu0 %v989_v34  ;;  %v1230_v48 = vpop.permute.xlu1 %1229 }
 0x6a0   :  { %v4225_v35 = vpop.eup %4224 }
 0x6a1   :  { %v992_v36 = vsel %vm165_vm2, %v4225_v35, 0.0 }
 0x6a2   :  { %993 = vadd.xlane.f32.xlu0 %v992_v36 }
 0x6b8   :  { %1151 = vrot.lane.b32.xlu0 %v4407_v10, %s4297_s30 }
 0x727   :  { %v991_v37 = vpop.xlane.xlu0 %990 }
 0x728   :  { %4226 = vrcp.f32 %v991_v37 }
 0x72b   :  { %v994_v38 = vpop.xlane.xlu0 %993 }
 0x72c   :  { %4228 = vrcp.f32 %v994_v38 }
 0x72f   :  { %v1152_v47 = vpop.permute.xlu0 %1151 }
 0x735   :  { %v4227_v40 = vpop.eup %4226 }
 0x736   :  { %v997_v41 = vmul.f32 %v4227_v40, %v4223_v33 }
 0x738   :  { %3990 = vmatmul.mubr.msk.f32.vlgmr.msra.gmra.mxu0 %vm165_vm2, %v997_v41 }
 0x739   :  { %v4229_v43 = vpop.eup %4228  ;;  %3998 = vmatpush3.xpose.msk.msra.mxu0 %vm165_vm2, %v1154_v39  ;;  %3999 = vmatprep.mubr.msk.f32.mxu0 %vm4287_vm1, %v4286_v6 }
 0x73a   :  { %v998_v46 = vmul.f32 %v4229_v43, %v4225_v35  ;;  %4007 = vmatprep.subr.mxu0 %v4286_v6 }
 0x73c   :  { %3995 = vmatmul.mubr.msk.f32.vlgmr.msra.gmra.mxu1 %vm165_vm2, %v998_v46  ;;  %4000 = vmatmul.mubr.msk.f32.vlgmr.msra.gmra.mxu0 %vm165_vm2, %v1152_v47 }
 0x73d   :  { %4003 = vmatpush3.xpose.msk.msra.mxu1 %vm165_vm2, %v1232_v45  ;;  %4004 = vmatprep.mubr.msk.f32.mxu1 %vm4287_vm1, %v4286_v6 }
 0x73e   :  { %4012 = vmatprep.subr.mxu1 %v4286_v6  ;;  %4009 = vmatprep.mubr.msk.f32.mxu0 %vm4287_vm1, %v4286_v6 }
 0x740   :  { %4005 = vmatmul.mubr.msk.f32.vlgmr.msra.gmra.mxu1 %vm165_vm2, %v1230_v48 }
 0x741   :  { %4014 = vmatprep.mubr.msk.f32.mxu1 %vm4287_vm1, %v4286_v6 }
 0x7f8   :  { %v1071_v49 = vpop.f32.mrf.mxu0 }
 0x7fa   :  { %v3991_v50 = vpop.f32.mrf.mxu0 }
 0x7fc   :  { %v1147_v51 = vpop.f32.mrf.mxu1  ;;  %v1225_v52 = vpop.f32.mrf.mxu0 }
 0x7fd   :  { %v1307_v53 = vsel %vm165_vm2, %v1225_v52, -inf }
 0x7fe   :  { %v3996_v54 = vpop.f32.mrf.mxu1  ;;  %1308 = vmax.xlane.f32.xlu0 %v1307_v53  ;;  %v4001_v55 = vpop.f32.mrf.mxu0 }
 0x7ff   :  { %v58_v54 = vld [vmem:[%s4931_s5 + $0x10] sm:$0xff]  ;;  %v57_v55 = vld [vmem:[%s4931_s5 + $0x8] sm:$0xff] }
 0x800   :  { %v1303_v56 = vpop.f32.mrf.mxu1 }
 0x801   :  { %v1310_v57 = vsel %vm165_vm2, %v1303_v56, -inf }
 0x802   :  { %1311 = vmax.xlane.f32.xlu1 %v1310_v57  ;;  %v4006_v58 = vpop.f32.mrf.mxu1  ;;  %v68_v57 = vld [vmem:[%s4932_s7 + $0x38] sm:$0xff] }
 0x803   :  { %v67_v58 = vld [vmem:[%s4932_s7 + $0x30] sm:$0xff] }
 0x813   :  { %1329 = vrot.lane.b32.xlu1 %v4407_v10, %s4944_s14 }
 0x817   :  { %1483 = vrot.lane.b32.xlu1 %v4499_v15, %s4942_s15 }
 0x81b   :  { %1485 = vrot.lane.b32.xlu1 %v4501_v17, %s4942_s15  ;;  %v53_v17 = vld [vmem:[%s4929_s3 + $0x10] sm:$0xff] }
 0x81f   :  { %1493 = vrot.lane.b32.xlu1 %v1147_v51, %s4940_s16 }
 0x887   :  { %v1309_v59 = vpop.xlane.xlu0 %1308 }
 0x888   :  { %v1313_v60 = vsub.f32 %v1225_v52, %v1309_v59  ;;  %v66_v59 = vld [vmem:[%s4932_s7 + $0x28] sm:$0xff] }
 0x88a   :  { %v1315_v61 = vmul.f32 1.442695, %v1313_v60  ;;  %v65_v60 = vld [vmem:[%s4932_s7 + $0x20] sm:$0xff] }
 0x88b   :  { %v1312_v62 = vpop.xlane.xlu1 %1311 }
 0x88c   :  { %4230 = vpow2.f32 %v1315_v61  ;;  %v1314_v63 = vsub.f32 %v1303_v56, %v1312_v62  ;;  %v56_v56 = vld [vmem:[%s4931_s5] sm:$0xff] }
 0x88e   :  { %v1317_v0 = vmul.f32 1.442695, %v1314_v63 }
 0x88f   :  { %v1330_v1 = vpop.permute.xlu1 %1329 }
 0x890   :  { %4232 = vpow2.f32 %v1317_v0  ;;  %4008 = vmatpush3.msra.mxu0 %v1330_v1 }
 0x893   :  { %v1484_v24 = vpop.permute.xlu1 %1483 }
 0x894   :  { %v1505_v27 = vsel %vm165_vm2, %v4461_v42, %v1484_v24  ;;  %v3725_v42 = vld [vmem:[%s4930_s4] ss:$0 sm:$0xff] }
 0x897   :  { %v1486_v25 = vpop.permute.xlu1 %1485 }
 0x898   :  { %v1506_v32 = vsel %vm165_vm2, %v4463_v44, %v1486_v25 }
 0x899   :  { %v4231_v10 = vpop.eup %4230 }
 0x89a   :  { %v1319_v3 = vsel %vm165_vm2, %v4231_v10, 0.0 }
 0x89b   :  { %1320 = vadd.xlane.f32.xlu0 %v1319_v3  ;;  %v1494_v28 = vpop.permute.xlu1 %1493 }
 0x89c   :  { %v1509_v33 = vsel %vm1507_vm4, %v1506_v32, %v1494_v28 }
 0x89d   :  { %v4233_v4 = vpop.eup %4232 }
 0x89e   :  { %v1322_v7 = vsel %vm165_vm2, %v4233_v4, 0.0 }
 0x89f   :  { %1323 = vadd.xlane.f32.xlu0 %v1322_v7 }
 0x8b5   :  { %1405 = vrot.lane.b32.xlu0 %v4411_v11, %s4944_s14  ;;  %v54_v11 = vld [vmem:[%s4929_s3 + $0x18] sm:$0xff]  ;;  %s4951_s14 = smov 24  }
 0x8b6   :  { %4017 = vmatprep.subr.mxu0 %v54_v11 }
 0x8b9   :  { %1491 = vrot.lane.b32.xlu0 %v1071_v49, %s4940_s16 }
 0x924   :  { %v1321_v8 = vpop.xlane.xlu0 %1320 }
 0x925   :  { %4234 = vrcp.f32 %v1321_v8  ;;  %v3729_v8 = vld [vmem:[%s4934_s10] ss:$0 sm:$0xff] }
 0x928   :  { %v1324_v9 = vpop.xlane.xlu0 %1323 }
 0x929   :  { %4236 = vrcp.f32 %v1324_v9 }
 0x92c   :  { %v1406_v12 = vpop.permute.xlu0 %1405 }
 0x92d   :  { %4013 = vmatpush3.msra.mxu1 %v1406_v12 }
 0x930   :  { %v1492_v26 = vpop.permute.xlu0 %1491 }
 0x931   :  { %v1508_v29 = vsel %vm1507_vm4, %v1505_v27, %v1492_v26  ;;  %v3733_v27 = vld [vmem:[%s4936_s8] ss:$0 sm:$0xff] }
 0x932   :  { %v4235_v13 = vpop.eup %4234 }
 0x933   :  { %v1327_v14 = vmul.f32 %v4235_v13, %v4231_v10 }
 0x935   :  { %4010 = vmatmul.mubr.msk.f32.vlgmr.msra.gmra.mxu0 %vm165_vm2, %v1327_v14 }
 0x936   :  { %v4237_v15 = vpop.eup %4236  ;;  %4018 = vmatpush3.msra.mxu0 %v54_v11  ;;  %v64_v11 = vld [vmem:[%s4932_s7 + $0x18] sm:$0xff] }
 0x937   :  { %v1328_v16 = vmul.f32 %v4237_v15, %v4233_v4  ;;  %4019 = vmatprep.subr.mxu0 %v53_v17  ;;  %v3728_v4 = vld [vmem:[%s4933_s9] ss:$0 sm:$0xff] }
 0x938   :  { %4020 = vmatpush3.msra.mxu0 %v53_v17  ;;  %v63_v17 = vld [vmem:[%s4932_s7 + $0x10] sm:$0xff] }
 0x939   :  { %4015 = vmatmul.mubr.msk.f32.vlgmr.msra.gmra.mxu1 %vm165_vm2, %v1328_v16  ;;  %4021 = vmatprep.subr.mxu0 %v52_v18 }
 0x93a   :  { %4022 = vmatpush3.msra.mxu0 %v52_v18  ;;  %v62_v18 = vld [vmem:[%s4932_s7 + $0x8] sm:$0xff] }
 0x93b   :  { %4023 = vmatprep.subr.mxu0 %v51_v19 }
 0x93c   :  { %4024 = vmatpush3.msra.mxu0 %v51_v19  ;;  %v61_v19 = vld [vmem:[%s4932_s7] sm:$0xff] }
 0x93d   :  { %4039 = vmatprep.subr.mxu0 %v68_v57 }
 0x9f5   :  { %v1401_v20 = vpop.f32.mrf.mxu0 }
 0x9f6   :  { %1499 = vrot.lane.b32.xlu0 %v1401_v20, %s4946_s17  ;;  %v3730_v20 = vld [vmem:[%s4935_s6] ss:$0 sm:$0xff] }
 0x9f7   :  { %v4011_v21 = vpop.f32.mrf.mxu0 }
 0x9f9   :  { %v1477_v22 = vpop.f32.mrf.mxu1 }
 0x9fa   :  { %1501 = vrot.lane.b32.xlu1 %v1477_v22, %s4946_s17 }
 0x9fb   :  { %v4016_v23 = vpop.f32.mrf.mxu1 }
 0xa68   :  { %v1500_v30 = vpop.permute.xlu0 %1499 }
 0xa69   :  { %v1511_v31 = vsel %vm1510_vm3, %v1508_v29, %v1500_v30 }
 0xa6a   :  { %4025 = vmatprep.mubr.msk.f32.mxu0 %vm80_vm0, %v1511_v31 }
 0xa6c   :  { %v1502_v34 = vpop.permute.xlu1 %1501 }
 0xa6d   :  { %v1512_v35 = vsel %vm1510_vm3, %v1509_v33, %v1502_v34 }
 0xa6e   :  { %4026 = vmatmul.mubr.msk.f32.vlgmr.msra.gmra.mxu0 %vm80_vm0, %v1512_v35 }
 0xa6f   :  { %4040 = vmatpush3.msra.mxu0 %v68_v57 }
 0xa70   :  { %4041 = vmatprep.subr.mxu0 %v67_v58 }
 0xa71   :  { %4042 = vmatpush3.msra.mxu0 %v67_v58 }
 0xa72   :  { %4043 = vmatprep.subr.mxu0 %v66_v59 }
 0xa73   :  { %4044 = vmatpush3.msra.mxu0 %v66_v59 }
 0xa74   :  { %4045 = vmatprep.subr.mxu0 %v65_v60 }
 0xa75   :  { %4046 = vmatpush3.msra.mxu0 %v65_v60  ;;  %v3737_v60 = vld [vmem:[%s4938_s12] ss:$0 sm:$0xff] }
 0xa76   :  { %4047 = vmatprep.subr.mxu0 %v64_v11 }
 0xa77   :  { %4048 = vmatpush3.msra.mxu0 %v64_v11 }
 0xa78   :  { %4049 = vmatprep.subr.mxu0 %v63_v17 }
 0xa79   :  { %4050 = vmatpush3.msra.mxu0 %v63_v17 }
 0xa7a   :  { %4051 = vmatprep.subr.mxu0 %v62_v18 }
 0xa7b   :  { %4052 = vmatpush3.msra.mxu0 %v62_v18 }
 0xa7c   :  { %4053 = vmatprep.subr.mxu0 %v61_v19 }
 0xa7d   :  { %4054 = vmatpush3.msra.mxu0 %v61_v19 }
 0xa7e   :  { %4079 = vmatprep.subr.mxu0 %v4286_v6 }
 0xb2e   :  { %v4027_v36 = vpop.f32.mrf.mxu0 }
 0xb2f   :  { %v1597_v37 = vadd.f32 %v4027_v36, %v3725_v42 }
 0xb30   :  { %v1591_v38 = vpop.f32.mrf.mxu0 }
 0xb31   :  { %v1592_v39 = vadd.f32 %v3725_v42, %v1591_v38  ;;  %v1601_v40 = vadd.f32 %v1597_v37, %v4394_v5 }
 0xb33   :  { %v1605_v41 = vsel %vm80_vm0, %v1601_v40, 0.0  ;;  %v1600_v44 = vadd.f32 %v1592_v39, %v4381_v2  ;;  %v59_v2 = vld [vmem:[%s4931_s5 + $0x18] sm:$0xff] }
 0xb34   :  { %1606 = vadd.xlane.f32.xlu1 %v1605_v41  ;;  %4028 = vmatprep.subr.mxu1 %v59_v2 }
 0xb35   :  { %v1602_v43 = vsel %vm80_vm0, %v1600_v44, 0.0  ;;  %4029 = vmatpush3.msra.mxu1 %v59_v2 }
 0xb36   :  { %1603 = vadd.xlane.f32.xlu0 %v1602_v43  ;;  %4030 = vmatprep.subr.mxu1 %v58_v54 }
 0xb37   :  { %4031 = vmatpush3.msra.mxu1 %v58_v54 }
 0xb38   :  { %4032 = vmatprep.subr.mxu1 %v57_v55 }
 0xb39   :  { %4033 = vmatpush3.msra.mxu1 %v57_v55  ;;  %v3736_v55 = vld [vmem:[%s4937_s11] ss:$0 sm:$0xff] }
 0xb3a   :  { %4034 = vmatprep.subr.mxu1 %v56_v56 }
 0xb3b   :  { %4035 = vmatpush3.msra.mxu1 %v56_v56 }
 0xbbd   :  { %v1607_v45 = vpop.xlane.xlu1 %1606 }
 0xbbe   :  { %v1610_v46 = vmul.f32 0.03125, %v1607_v45 }
 0xbbf   :  { %v1604_v47 = vpop.xlane.xlu0 %1603 }
 0xbc0   :  { %v1609_v48 = vmul.f32 0.03125, %v1604_v47  ;;  %v1612_v49 = vsub.f32 %v1601_v40, %v1610_v46  ;;  %v3741_v46 = vld [vmem:[%s4926_s1 + $0x38] sm:$0xff]  ;;  %v3740_v47 = vld [vmem:[%s4926_s1 + $0x30] sm:$0xff] }
 0xbc1   :  { %4058 = vmatprep.subr.mxu1 %v3741_v46 }
 0xbc2   :  { %v1611_v50 = vsub.f32 %v1600_v44, %v1609_v48  ;;  %v1614_v53 = vmul.f32 %v1612_v49, %v1612_v49  ;;  %v3739_v48 = vld [vmem:[%s4926_s1 + $0x28] sm:$0xff] }
 0xbc4   :  { %v1613_v51 = vmul.f32 %v1611_v50, %v1611_v50  ;;  %v1618_v5 = vsel %vm80_vm0, %v1614_v53, 0.0 }
 0xbc6   :  { %v1615_v52 = vsel %vm80_vm0, %v1613_v51, 0.0 }
 0xbc7   :  { %1616 = vadd.xlane.f32.xlu0 %v1615_v52 }
 0xbcb   :  { %1619 = vadd.xlane.f32.xlu0 %v1618_v5 }
 0xc50   :  { %v1617_v61 = vpop.xlane.xlu0 %1616 }
 0xc51   :  { %v1621_v62 = vmul.f32 0.03125, %v1617_v61 }
 0xc53   :  { %v1623_v63 = vadd.f32 1e-05, %v1621_v62 }
 0xc54   :  { %v1620_v0 = vpop.xlane.xlu0 %1619 }
 0xc55   :  { %4238 = vrsqrt.f32 %v1623_v63  ;;  %v1622_v1 = vmul.f32 0.03125, %v1620_v0  ;;  %v3766_v0 = vld [vmem:[%s4928_s2 + $0x1] ss:$0 sm:$0xff]  ;;  %s4948_s2 = smov 40  }
 0xc57   :  { %v1624_v10 = vadd.f32 1e-05, %v1622_v1 }
 0xc59   :  { %4240 = vrsqrt.f32 %v1624_v10 }
 0xc62   :  { %v4239_v3 = vpop.eup %4238 }
 0xc63   :  { %v1627_v7 = vmul.f32 %v4239_v3, %v1611_v50 }
 0xc65   :  { %v1635_v9 = vmul.f32 %v3728_v4, %v1627_v7 }
 0xc66   :  { %v4241_v12 = vpop.eup %4240 }
 0xc67   :  { %v1628_v13 = vmul.f32 %v4241_v12, %v1612_v49  ;;  %v1643_v14 = vadd.f32 %v3729_v8, %v1635_v9  ;;  %v3738_v49 = vld [vmem:[%s4926_s1 + $0x20] sm:$0xff] }
 0xc69   :  { %v1636_v15 = vmul.f32 %v3728_v4, %v1628_v13  ;;  %4036 = vmatprep.mubr.msk.f32.mxu1 %vm80_vm0, %v1643_v14 }
 0xc6b   :  { %v1644_v16 = vadd.f32 %v3729_v8, %v1636_v15 }
 0xc6d   :  { %4037 = vmatmul.mubr.msk.f32.vlgmr.msra.gmra.mxu1 %vm80_vm0, %v1644_v16 }
 0xc6e   :  { %4059 = vmatpush3.msra.mxu1 %v3741_v46 }
 0xc6f   :  { %4060 = vmatprep.subr.mxu1 %v3740_v47 }
 0xc70   :  { %4061 = vmatpush3.msra.mxu1 %v3740_v47 }
 0xc71   :  { %4062 = vmatprep.subr.mxu1 %v3739_v48 }
 0xc72   :  { %4063 = vmatpush3.msra.mxu1 %v3739_v48 }
 0xc73   :  { %4064 = vmatprep.subr.mxu1 %v3738_v49 }
 0xc74   :  { %4065 = vmatpush3.msra.mxu1 %v3738_v49 }
 0xc75   :  { %4069 = vmatprep.subr.mxu1 %v4286_v6 }
 0xd2d   :  { %v4038_v21 = vpop.f32.mrf.mxu1 }
 0xd2e   :  { %v1729_v22 = vadd.f32 %v4038_v21, %v3730_v20 }
 0xd2f   :  { %v1723_v23 = vpop.f32.mrf.mxu1 }
 0xd30   :  { %v1724_v24 = vadd.f32 %v3730_v20, %v1723_v23  ;;  %v1733_v26 = vmax.f32 %v1729_v22, 0.0 }
 0xd32   :  { %v1732_v25 = vmax.f32 %v1724_v24, 0.0 }
 0xd34   :  { %4055 = vmatprep.mubr.msk.f32.mxu0 %vm1740_vm5, %v1732_v25 }
 0xd35   :  { %4056 = vmatmul.mubr.msk.f32.vlgmr.msra.gmra.mxu0 %vm1740_vm5, %v1733_v26 }
 0xd36   :  { %4081 = vmatprep.mubr.msk.f32.mxu0 %vm4287_vm1, %v4286_v6 }
 0xdf5   :  { %v4057_v28 = vpop.f32.mrf.mxu0 }
 0xdf6   :  { %v1819_v29 = vadd.f32 %v4057_v28, %v3733_v27 }
 0xdf7   :  { %v1813_v30 = vpop.f32.mrf.mxu0 }
 0xdf8   :  { %v1814_v31 = vadd.f32 %v3733_v27, %v1813_v30  ;;  %v1823_v32 = vadd.f32 %v1819_v29, %v1644_v16 }
 0xdfa   :  { %v1827_v33 = vsel %vm80_vm0, %v1823_v32, 0.0  ;;  %v1822_v34 = vadd.f32 %v1814_v31, %v1643_v14 }
 0xdfb   :  { %1828 = vadd.xlane.f32.xlu0 %v1827_v33 }
 0xdfc   :  { %v1824_v35 = vsel %vm80_vm0, %v1822_v34, 0.0 }
 0xdfd   :  { %1825 = vadd.xlane.f32.xlu1 %v1824_v35 }
 0xe84   :  { %v1829_v42 = vpop.xlane.xlu0 %1828 }
 0xe85   :  { %v1831_v36 = vmul.f32 0.03125, %v1829_v42 }
 0xe86   :  { %v1826_v37 = vpop.xlane.xlu1 %1825 }
 0xe87   :  { %v1833_v38 = vsub.f32 %v1823_v32, %v1831_v36  ;;  %v1830_v39 = vmul.f32 0.03125, %v1826_v37 }
 0xe89   :  { %v1832_v40 = vsub.f32 %v1822_v34, %v1830_v39  ;;  %v1835_v41 = vmul.f32 %v1833_v38, %v1833_v38 }
 0xe8b   :  { %v1839_v44 = vsel %vm80_vm0, %v1835_v41, 0.0  ;;  %v1834_v43 = vmul.f32 %v1832_v40, %v1832_v40 }
 0xe8c   :  { %1840 = vadd.xlane.f32.xlu0 %v1839_v44 }
 0xe8d   :  { %v1836_v45 = vsel %vm80_vm0, %v1834_v43, 0.0 }
 0xe8e   :  { %1837 = vadd.xlane.f32.xlu1 %v1836_v45 }
 0xf15   :  { %v1841_v50 = vpop.xlane.xlu0 %1840 }
 0xf16   :  { %v1843_v51 = vmul.f32 0.03125, %v1841_v50 }
 0xf17   :  { %v1838_v52 = vpop.xlane.xlu1 %1837 }
 0xf18   :  { %v1845_v53 = vadd.f32 1e-05, %v1843_v51  ;;  %v1842_v5 = vmul.f32 0.03125, %v1838_v52 }
 0xf1a   :  { %4242 = vrsqrt.f32 %v1845_v53  ;;  %v1844_v2 = vadd.f32 1e-05, %v1842_v5 }
 0xf1c   :  { %4244 = vrsqrt.f32 %v1844_v2 }
 0xf27   :  { %v4243_v54 = vpop.eup %4242 }
 0xf28   :  { %v1849_v56 = vmul.f32 %v4243_v54, %v1833_v38 }
 0xf29   :  { %v4245_v57 = vpop.eup %4244 }
 0xf2a   :  { %v1848_v58 = vmul.f32 %v4245_v57, %v1832_v40  ;;  %v1857_v59 = vmul.f32 %v3736_v55, %v1849_v56 }
 0xf2c   :  { %v1856_v61 = vmul.f32 %v3736_v55, %v1848_v58  ;;  %v4666_v63 = vadd.f32 %v3737_v60, %v1857_v59 }
 0xf2e   :  { %v4664_v62 = vadd.f32 %v3737_v60, %v1856_v61 }
 0xf30   :  { %4066 = vmatprep.mubr.msk.f32.mxu1 %vm80_vm0, %v4664_v62 }
 0xf31   :  { %4067 = vmatmul.mubr.msk.f32.vlgmr.msra.gmra.mxu1 %vm80_vm0, %v4666_v63 }
 0xf32   :  { %4071 = vmatprep.mubr.msk.f32.mxu1 %vm4287_vm1, %v4286_v6 }
 0xff1   :  { %v4068_v1 = vpop.f32.mrf.mxu1 }
 0xff2   :  { %v4677_v10 = vadd.f32 %v4068_v1, %v3766_v0 }
 0xff3   :  { %v1984_v3 = vpop.f32.mrf.mxu1 }
 0xff4   :  { %v4679_v4 = vadd.f32 %v3766_v0, %v1984_v3  ;;  %2071 = vrot.lane.b32.xlu0 %v4677_v10, %s4288_s21 }
 0xff6   :  { %1994 = vrot.lane.b32.xlu1 %v4679_v4, %s4288_s21  ;;  %s4949_s21 = smov 8  }
0x1066   :  { %v2072_v8 = vpop.permute.xlu0 %2071 }
0x1068   :  { %v1995_v7 = vpop.permute.xlu1 %1994 }
0x1069   :  { %4070 = vmatpush3.xpose.msk.msra.mxu1 %vm165_vm2, %v1995_v7 }
0x106a   :  { %4074 = vmatprep.subr.mxu1 %v4286_v6 }
0x106c   :  { %4072 = vmatmul.mubr.msk.f32.vlgmr.msra.gmra.mxu1 %vm165_vm2, %v4679_v4 }
0x106d   :  { %4075 = vmatpush3.xpose.msk.msra.mxu1 %vm165_vm2, %v2072_v8  ;;  %4076 = vmatprep.mubr.msk.f32.mxu1 %vm4287_vm1, %v4286_v6 }
0x106e   :  { %4084 = vmatprep.subr.mxu1 %v4286_v6 }
0x1070   :  { %4077 = vmatmul.mubr.msk.f32.vlgmr.msra.gmra.mxu1 %vm165_vm2, %v4677_v10 }
0x1071   :  { %4086 = vmatprep.mubr.msk.f32.mxu1 %vm4287_vm1, %v4286_v6 }
0x112c   :  { %v2066_v9 = vpop.f32.mrf.mxu1 }
0x112d   :  { %v2147_v12 = vsel %vm165_vm2, %v2066_v9, -inf }
0x112e   :  { %2148 = vmax.xlane.f32.xlu1 %v2147_v12  ;;  %v4073_v13 = vpop.f32.mrf.mxu1 }
0x1130   :  { %v2143_v14 = vpop.f32.mrf.mxu1 }
0x1131   :  { %v2150_v15 = vsel %vm165_vm2, %v2143_v14, -inf }
0x1132   :  { %2151 = vmax.xlane.f32.xlu0 %v2150_v15  ;;  %v4078_v16 = vpop.f32.mrf.mxu1 }
0x113f   :  { %2169 = vrot.lane.b32.xlu1 %v4679_v4, %s4289_s22 }
0x1143   :  { %2323 = vrot.lane.b32.xlu1 %v4679_v4, %s4290_s23 }
0x1147   :  { %2401 = vrot.lane.b32.xlu1 %v4677_v10, %s4290_s23 }
0x1148   :  { %2245 = vrot.lane.b32.xlu0 %v4677_v10, %s4289_s22  ;;  %s4950_s22 = smov 16  }
0x11b7   :  { %v2149_v11 = vpop.xlane.xlu1 %2148 }
0x11b8   :  { %v2153_v17 = vsub.f32 %v2066_v9, %v2149_v11 }
0x11ba   :  { %v2155_v18 = vmul.f32 1.442695, %v2153_v17 }
0x11bb   :  { %v2170_v19 = vpop.permute.xlu1 %2169  ;;  %v2152_v20 = vpop.xlane.xlu0 %2151 }
0x11bc   :  { %4246 = vpow2.f32 %v2155_v18  ;;  %v2154_v21 = vsub.f32 %v2143_v14, %v2152_v20  ;;  %4080 = vmatpush3.msra.mxu0 %v2170_v19 }
0x11bd   :  { %4089 = vmatprep.subr.mxu0 %v4286_v6 }
0x11be   :  { %v2157_v22 = vmul.f32 1.442695, %v2154_v21 }
0x11bf   :  { %v2246_v23 = vpop.permute.xlu0 %2245  ;;  %v2324_v28 = vpop.permute.xlu1 %2323 }
0x11c0   :  { %4248 = vpow2.f32 %v2157_v22  ;;  %4085 = vmatpush3.msra.mxu1 %v2246_v23 }
0x11c1   :  { %4094 = vmatprep.subr.mxu1 %v4286_v6 }
0x11c3   :  { %v2402_v29 = vpop.permute.xlu1 %2401 }
0x11c9   :  { %v4247_v24 = vpop.eup %4246 }
0x11ca   :  { %v2159_v25 = vsel %vm165_vm2, %v4247_v24, 0.0 }
0x11cb   :  { %2160 = vadd.xlane.f32.xlu1 %v2159_v25 }
0x11cd   :  { %v4249_v26 = vpop.eup %4248 }
0x11ce   :  { %v2162_v27 = vsel %vm165_vm2, %v4249_v26, 0.0 }
0x11cf   :  { %2163 = vadd.xlane.f32.xlu0 %v2162_v27 }
0x11dc   :  { %2399 = vrot.lane.b32.xlu1 %v4677_v10, %s4291_s24 }
0x11e5   :  { %2321 = vrot.lane.b32.xlu0 %v4679_v4, %s4291_s24 }
0x1254   :  { %v2161_v30 = vpop.xlane.xlu1 %2160 }
0x1255   :  { %4250 = vrcp.f32 %v2161_v30 }
0x1258   :  { %v2164_v31 = vpop.xlane.xlu0 %2163  ;;  %v2400_v36 = vpop.permute.xlu1 %2399 }
0x1259   :  { %4252 = vrcp.f32 %v2164_v31 }
0x125c   :  { %v2322_v42 = vpop.permute.xlu0 %2321 }
0x1262   :  { %v4251_v32 = vpop.eup %4250 }
0x1263   :  { %v2167_v33 = vmul.f32 %v4251_v32, %v4247_v24 }
0x1265   :  { %4082 = vmatmul.mubr.msk.f32.vlgmr.msra.gmra.mxu0 %vm165_vm2, %v2167_v33 }
0x1266   :  { %v4253_v34 = vpop.eup %4252  ;;  %4090 = vmatpush3.xpose.msk.msra.mxu0 %vm165_vm2, %v2324_v28  ;;  %4091 = vmatprep.mubr.msk.f32.mxu0 %vm4287_vm1, %v4286_v6 }
0x1267   :  { %v2168_v35 = vmul.f32 %v4253_v34, %v4249_v26  ;;  %4099 = vmatprep.subr.mxu0 %v4286_v6 }
0x1269   :  { %4087 = vmatmul.mubr.msk.f32.vlgmr.msra.gmra.mxu1 %vm165_vm2, %v2168_v35  ;;  %4092 = vmatmul.mubr.msk.f32.vlgmr.msra.gmra.mxu0 %vm165_vm2, %v2322_v42 }
0x126a   :  { %4095 = vmatpush3.xpose.msk.msra.mxu1 %vm165_vm2, %v2402_v29  ;;  %4096 = vmatprep.mubr.msk.f32.mxu1 %vm4287_vm1, %v4286_v6 }
0x126b   :  { %4104 = vmatprep.subr.mxu1 %v4286_v6  ;;  %4101 = vmatprep.mubr.msk.f32.mxu0 %vm4287_vm1, %v4286_v6 }
0x126d   :  { %4097 = vmatmul.mubr.msk.f32.vlgmr.msra.gmra.mxu1 %vm165_vm2, %v2400_v36 }
0x126e   :  { %4106 = vmatprep.mubr.msk.f32.mxu1 %vm4287_vm1, %v4286_v6 }
0x1325   :  { %v4731_v37 = vpop.f32.mrf.mxu0 }
0x1327   :  { %v4083_v38 = vpop.f32.mrf.mxu0 }
0x1329   :  { %v4733_v39 = vpop.f32.mrf.mxu1  ;;  %v2395_v40 = vpop.f32.mrf.mxu0 }
0x132a   :  { %v2477_v41 = vsel %vm165_vm2, %v2395_v40, -inf }
0x132b   :  { %2478 = vmax.xlane.f32.xlu0 %v2477_v41  ;;  %v4088_v44 = vpop.f32.mrf.mxu1  ;;  %v4093_v43 = vpop.f32.mrf.mxu0 }
0x132d   :  { %v2473_v45 = vpop.f32.mrf.mxu1 }
0x132e   :  { %v2480_v46 = vsel %vm165_vm2, %v2473_v45, -inf }
0x132f   :  { %2481 = vmax.xlane.f32.xlu1 %v2480_v46  ;;  %v4098_v47 = vpop.f32.mrf.mxu1 }
0x1340   :  { %2499 = vrot.lane.b32.xlu1 %v4679_v4, %s4292_s25 }
0x1341   :  { %2575 = vrot.lane.b32.xlu0 %v4677_v10, %s4292_s25 }
0x1344   :  { %2653 = vrot.lane.b32.xlu1 %v4679_v4, %s4293_s26 }
0x1348   :  { %2731 = vrot.lane.b32.xlu1 %v4677_v10, %s4293_s26 }
0x134c   :  { %2729 = vrot.lane.b32.xlu1 %v4677_v10, %s4294_s27 }
0x13b4   :  { %v2479_v48 = vpop.xlane.xlu0 %2478 }
0x13b5   :  { %v2483_v49 = vsub.f32 %v2395_v40, %v2479_v48 }
0x13b7   :  { %v2485_v50 = vmul.f32 1.442695, %v2483_v49 }
0x13b8   :  { %v2576_v51 = vpop.permute.xlu0 %2575  ;;  %v2482_v52 = vpop.xlane.xlu1 %2481 }
0x13b9   :  { %4254 = vpow2.f32 %v2485_v50  ;;  %v2484_v53 = vsub.f32 %v2473_v45, %v2482_v52  ;;  %4105 = vmatpush3.msra.mxu1 %v2576_v51 }
0x13ba   :  { %4114 = vmatprep.subr.mxu1 %v4286_v6 }
0x13bb   :  { %v2487_v5 = vmul.f32 1.442695, %v2484_v53 }
0x13bc   :  { %v2500_v2 = vpop.permute.xlu1 %2499 }
0x13bd   :  { %4256 = vpow2.f32 %v2487_v5  ;;  %4100 = vmatpush3.msra.mxu0 %v2500_v2 }
0x13be   :  { %4109 = vmatprep.subr.mxu0 %v4286_v6 }
0x13c0   :  { %v2654_v60 = vpop.permute.xlu1 %2653 }
0x13c4   :  { %v2732_v3 = vpop.permute.xlu1 %2731 }
0x13c6   :  { %v4255_v54 = vpop.eup %4254 }
0x13c7   :  { %v2489_v55 = vsel %vm165_vm2, %v4255_v54, 0.0 }
0x13c8   :  { %2490 = vadd.xlane.f32.xlu0 %v2489_v55  ;;  %v2730_v9 = vpop.permute.xlu1 %2729 }
0x13ca   :  { %v4257_v56 = vpop.eup %4256 }
0x13cb   :  { %v2492_v57 = vsel %vm165_vm2, %v4257_v56, 0.0 }
0x13cc   :  { %2493 = vadd.xlane.f32.xlu0 %v2492_v57 }
0x13e2   :  { %2651 = vrot.lane.b32.xlu0 %v4679_v4, %s4294_s27 }
0x1451   :  { %v2491_v58 = vpop.xlane.xlu0 %2490 }
0x1452   :  { %4258 = vrcp.f32 %v2491_v58 }
0x1455   :  { %v2494_v59 = vpop.xlane.xlu0 %2493 }
0x1456   :  { %4260 = vrcp.f32 %v2494_v59 }
0x1459   :  { %v2652_v8 = vpop.permute.xlu0 %2651 }
0x145f   :  { %v4259_v61 = vpop.eup %4258 }
0x1460   :  { %v2497_v0 = vmul.f32 %v4259_v61, %v4255_v54 }
0x1462   :  { %4102 = vmatmul.mubr.msk.f32.vlgmr.msra.gmra.mxu0 %vm165_vm2, %v2497_v0 }
0x1463   :  { %v4261_v1 = vpop.eup %4260  ;;  %4110 = vmatpush3.xpose.msk.msra.mxu0 %vm165_vm2, %v2654_v60  ;;  %4111 = vmatprep.mubr.msk.f32.mxu0 %vm4287_vm1, %v4286_v6 }
0x1464   :  { %v2498_v7 = vmul.f32 %v4261_v1, %v4257_v56  ;;  %4119 = vmatprep.subr.mxu0 %v4286_v6 }
0x1466   :  { %4107 = vmatmul.mubr.msk.f32.vlgmr.msra.gmra.mxu1 %vm165_vm2, %v2498_v7  ;;  %4112 = vmatmul.mubr.msk.f32.vlgmr.msra.gmra.mxu0 %vm165_vm2, %v2652_v8 }
0x1467   :  { %4115 = vmatpush3.xpose.msk.msra.mxu1 %vm165_vm2, %v2732_v3  ;;  %4116 = vmatprep.mubr.msk.f32.mxu1 %vm4287_vm1, %v4286_v6 }
0x1468   :  { %4124 = vmatprep.subr.mxu1 %v4286_v6  ;;  %4121 = vmatprep.mubr.msk.f32.mxu0 %vm4287_vm1, %v4286_v6 }
0x146a   :  { %4117 = vmatmul.mubr.msk.f32.vlgmr.msra.gmra.mxu1 %vm165_vm2, %v2730_v9 }
0x146b   :  { %4126 = vmatprep.mubr.msk.f32.mxu1 %vm4287_vm1, %v4286_v6 }
0x1522   :  { %v4769_v12 = vpop.f32.mrf.mxu0 }
0x1524   :  { %v4103_v13 = vpop.f32.mrf.mxu0 }
0x1525   :  { %v3745_v13 = vld [vmem:[%s4929_s3 + $0x30] sm:$0xff] }
0x1526   :  { %v4771_v14 = vpop.f32.mrf.mxu1  ;;  %v2725_v15 = vpop.f32.mrf.mxu0 }
0x1527   :  { %v2807_v16 = vsel %vm165_vm2, %v2725_v15, -inf }
0x1528   :  { %2808 = vmax.xlane.f32.xlu0 %v2807_v16  ;;  %v4108_v11 = vpop.f32.mrf.mxu1  ;;  %v4113_v17 = vpop.f32.mrf.mxu0 }
0x152a   :  { %v2803_v18 = vpop.f32.mrf.mxu1 }
0x152b   :  { %v2810_v19 = vsel %vm165_vm2, %v2803_v18, -inf }
0x152c   :  { %2811 = vmax.xlane.f32.xlu1 %v2810_v19  ;;  %v4118_v20 = vpop.f32.mrf.mxu1 }
0x153d   :  { %2829 = vrot.lane.b32.xlu1 %v4679_v4, %s4295_s28 }
0x153e   :  { %2905 = vrot.lane.b32.xlu0 %v4677_v10, %s4295_s28 }
0x1541   :  { %2983 = vrot.lane.b32.xlu1 %v4679_v4, %s4296_s29 }
0x1545   :  { %3061 = vrot.lane.b32.xlu1 %v4677_v10, %s4296_s29 }
0x1549   :  { %3059 = vrot.lane.b32.xlu1 %v4677_v10, %s4297_s30 }
0x15b1   :  { %v2809_v21 = vpop.xlane.xlu0 %2808 }
0x15b2   :  { %v2813_v22 = vsub.f32 %v2725_v15, %v2809_v21  ;;  %v3743_v15 = vld [vmem:[%s4929_s3 + $0x20] sm:$0xff] }
0x15b4   :  { %v2815_v23 = vmul.f32 1.442695, %v2813_v22 }
0x15b5   :  { %v2906_v24 = vpop.permute.xlu0 %2905  ;;  %v2812_v25 = vpop.xlane.xlu1 %2811 }
0x15b6   :  { %4262 = vpow2.f32 %v2815_v23  ;;  %v2814_v26 = vsub.f32 %v2803_v18, %v2812_v25  ;;  %4125 = vmatpush3.msra.mxu1 %v2906_v24 }
0x15b7   :  { %4134 = vmatprep.subr.mxu1 %v4286_v6 }
0x15b8   :  { %v2817_v27 = vmul.f32 1.442695, %v2814_v26 }
0x15b9   :  { %v2830_v28 = vpop.permute.xlu1 %2829 }
0x15ba   :  { %4264 = vpow2.f32 %v2817_v27  ;;  %4120 = vmatpush3.msra.mxu0 %v2830_v28 }
0x15bb   :  { %4129 = vmatprep.subr.mxu0 %v4286_v6 }
0x15bd   :  { %v2984_v35 = vpop.permute.xlu1 %2983 }
0x15c1   :  { %v3062_v40 = vpop.permute.xlu1 %3061 }
0x15c3   :  { %v4263_v29 = vpop.eup %4262 }
0x15c4   :  { %v2819_v30 = vsel %vm165_vm2, %v4263_v29, 0.0 }
0x15c5   :  { %2820 = vadd.xlane.f32.xlu0 %v2819_v30  ;;  %v3060_v43 = vpop.permute.xlu1 %3059 }
0x15c7   :  { %v4265_v31 = vpop.eup %4264 }
0x15c8   :  { %v2822_v32 = vsel %vm165_vm2, %v4265_v31, 0.0 }
0x15c9   :  { %2823 = vadd.xlane.f32.xlu0 %v2822_v32 }
0x15df   :  { %2981 = vrot.lane.b32.xlu0 %v4679_v4, %s4297_s30 }
0x164e   :  { %v2821_v33 = vpop.xlane.xlu0 %2820 }
0x164f   :  { %4266 = vrcp.f32 %v2821_v33 }
0x1652   :  { %v2824_v34 = vpop.xlane.xlu0 %2823 }
0x1653   :  { %4268 = vrcp.f32 %v2824_v34 }
0x1656   :  { %v2982_v44 = vpop.permute.xlu0 %2981 }
0x165c   :  { %v4267_v42 = vpop.eup %4266 }
0x165d   :  { %v2827_v36 = vmul.f32 %v4267_v42, %v4263_v29 }
0x165f   :  { %4122 = vmatmul.mubr.msk.f32.vlgmr.msra.gmra.mxu0 %vm165_vm2, %v2827_v36 }
0x1660   :  { %v4269_v38 = vpop.eup %4268  ;;  %4130 = vmatpush3.xpose.msk.msra.mxu0 %vm165_vm2, %v2984_v35  ;;  %4131 = vmatprep.mubr.msk.f32.mxu0 %vm4287_vm1, %v4286_v6 }
0x1661   :  { %v2828_v41 = vmul.f32 %v4269_v38, %v4265_v31  ;;  %4139 = vmatprep.subr.mxu0 %v4286_v6 }
0x1663   :  { %4127 = vmatmul.mubr.msk.f32.vlgmr.msra.gmra.mxu1 %vm165_vm2, %v2828_v41  ;;  %4132 = vmatmul.mubr.msk.f32.vlgmr.msra.gmra.mxu0 %vm165_vm2, %v2982_v44 }
0x1664   :  { %4135 = vmatpush3.xpose.msk.msra.mxu1 %vm165_vm2, %v3062_v40  ;;  %4136 = vmatprep.mubr.msk.f32.mxu1 %vm4287_vm1, %v4286_v6 }
0x1665   :  { %4144 = vmatprep.subr.mxu1 %v4286_v6  ;;  %4141 = vmatprep.mubr.msk.f32.mxu0 %vm4287_vm1, %v4286_v6 }
0x1667   :  { %4137 = vmatmul.mubr.msk.f32.vlgmr.msra.gmra.mxu1 %vm165_vm2, %v3060_v43 }
0x1668   :  { %4146 = vmatprep.mubr.msk.f32.mxu1 %vm4287_vm1, %v4286_v6 }
0x171f   :  { %v2901_v45 = vpop.f32.mrf.mxu0 }
0x1721   :  { %v4123_v46 = vpop.f32.mrf.mxu0 }
0x1723   :  { %v2977_v47 = vpop.f32.mrf.mxu1  ;;  %v3055_v48 = vpop.f32.mrf.mxu0 }
0x1724   :  { %v3137_v49 = vsel %vm165_vm2, %v3055_v48, -inf }
0x1725   :  { %3138 = vmax.xlane.f32.xlu0 %v3137_v49  ;;  %v4128_v50 = vpop.f32.mrf.mxu1  ;;  %v4133_v51 = vpop.f32.mrf.mxu0  ;;  %v3750_v49 = vld [vmem:[%s4931_s5 + $0x30] sm:$0xff] }
0x1726   :  { %v3749_v50 = vld [vmem:[%s4931_s5 + $0x28] sm:$0xff]  ;;  %v3748_v51 = vld [vmem:[%s4931_s5 + $0x20] sm:$0xff] }
0x1727   :  { %v3133_v52 = vpop.f32.mrf.mxu1 }
0x1728   :  { %v3140_v53 = vsel %vm165_vm2, %v3133_v52, -inf }
0x1729   :  { %3141 = vmax.xlane.f32.xlu1 %v3140_v53  ;;  %v4138_v5 = vpop.f32.mrf.mxu1  ;;  %v3759_v53 = vld [vmem:[%s4932_s7 + $0x70] sm:$0xff] }
0x172a   :  { %v3758_v5 = vld [vmem:[%s4932_s7 + $0x68] sm:$0xff] }
0x173a   :  { %3159 = vrot.lane.b32.xlu1 %v4679_v4, %s4948_s2 }
0x173e   :  { %3313 = vrot.lane.b32.xlu1 %v4769_v12, %s4949_s21 }
0x1742   :  { %3315 = vrot.lane.b32.xlu1 %v4771_v14, %s4949_s21  ;;  %v3744_v14 = vld [vmem:[%s4929_s3 + $0x28] sm:$0xff] }
0x1746   :  { %3323 = vrot.lane.b32.xlu1 %v2977_v47, %s4950_s22 }
0x17ae   :  { %v3139_v6 = vpop.xlane.xlu0 %3138 }
0x17af   :  { %v3143_v2 = vsub.f32 %v3055_v48, %v3139_v6  ;;  %v3757_v6 = vld [vmem:[%s4932_s7 + $0x60] sm:$0xff] }
0x17b1   :  { %v3145_v54 = vmul.f32 1.442695, %v3143_v2 }
0x17b2   :  { %v3142_v55 = vpop.xlane.xlu1 %3141 }
0x17b3   :  { %4270 = vpow2.f32 %v3145_v54  ;;  %v3144_v56 = vsub.f32 %v3133_v52, %v3142_v55  ;;  %v3760_v52 = vld [vmem:[%s4932_s7 + $0x78] sm:$0xff] }
0x17b5   :  { %v3147_v57 = vmul.f32 1.442695, %v3144_v56 }
0x17b6   :  { %v3160_v58 = vpop.permute.xlu1 %3159 }
0x17b7   :  { %4272 = vpow2.f32 %v3147_v57  ;;  %4140 = vmatpush3.msra.mxu0 %v3160_v58 }
0x17ba   :  { %v3314_v19 = vpop.permute.xlu1 %3313 }
0x17bb   :  { %v3335_v22 = vsel %vm165_vm2, %v4731_v37, %v3314_v19  ;;  %v3793_v37 = vld [vmem:[%s4930_s4 + $0x1] ss:$0 sm:$0xff] }
0x17be   :  { %v3316_v20 = vpop.permute.xlu1 %3315 }
0x17bf   :  { %v3336_v27 = vsel %vm165_vm2, %v4733_v39, %v3316_v20 }
0x17c0   :  { %v4271_v59 = vpop.eup %4270 }
0x17c1   :  { %v3149_v4 = vsel %vm165_vm2, %v4271_v59, 0.0 }
0x17c2   :  { %3150 = vadd.xlane.f32.xlu0 %v3149_v4  ;;  %v3324_v23 = vpop.permute.xlu1 %3323  ;;  %v3796_v4 = vld [vmem:[%s4933_s9 + $0x1] ss:$0 sm:$0xff] }
0x17c3   :  { %v3338_v28 = vsel %vm1507_vm4, %v3336_v27, %v3324_v23 }
0x17c4   :  { %v4273_v60 = vpop.eup %4272 }
0x17c5   :  { %v3152_v61 = vsel %vm165_vm2, %v4273_v60, 0.0 }
0x17c6   :  { %3153 = vadd.xlane.f32.xlu0 %v3152_v61  ;;  %v3797_v61 = vld [vmem:[%s4934_s10 + $0x1] ss:$0 sm:$0xff] }
0x17dc   :  { %3235 = vrot.lane.b32.xlu0 %v4677_v10, %s4948_s2  ;;  %v3746_v10 = vld [vmem:[%s4929_s3 + $0x38] sm:$0xff] }
0x17dd   :  { %4149 = vmatprep.subr.mxu0 %v3746_v10 }
0x17e0   :  { %3321 = vrot.lane.b32.xlu0 %v2901_v45, %s4950_s22 }
0x184b   :  { %v3151_v0 = vpop.xlane.xlu0 %3150 }
0x184c   :  { %4274 = vrcp.f32 %v3151_v0 }
0x184f   :  { %v3154_v1 = vpop.xlane.xlu0 %3153 }
0x1850   :  { %4276 = vrcp.f32 %v3154_v1 }
0x1853   :  { %v3236_v3 = vpop.permute.xlu0 %3235 }
0x1854   :  { %4145 = vmatpush3.msra.mxu1 %v3236_v3 }
0x1857   :  { %v3322_v21 = vpop.permute.xlu0 %3321 }
0x1858   :  { %v3337_v24 = vsel %vm1507_vm4, %v3335_v22, %v3322_v21  ;;  %v3801_v21 = vld [vmem:[%s4936_s8 + $0x1] ss:$0 sm:$0xff] }
0x1859   :  { %v4275_v7 = vpop.eup %4274 }
0x185a   :  { %v3157_v8 = vmul.f32 %v4275_v7, %v4271_v59 }
0x185c   :  { %4142 = vmatmul.mubr.msk.f32.vlgmr.msra.gmra.mxu0 %vm165_vm2, %v3157_v8 }
0x185d   :  { %v4277_v9 = vpop.eup %4276  ;;  %4150 = vmatpush3.msra.mxu0 %v3746_v10  ;;  %v3755_v10 = vld [vmem:[%s4932_s7 + $0x50] sm:$0xff] }
0x185e   :  { %v3158_v12 = vmul.f32 %v4277_v9, %v4273_v60  ;;  %4151 = vmatprep.subr.mxu0 %v3745_v13 }
0x185f   :  { %4152 = vmatpush3.msra.mxu0 %v3745_v13  ;;  %v3754_v13 = vld [vmem:[%s4932_s7 + $0x48] sm:$0xff] }
0x1860   :  { %4147 = vmatmul.mubr.msk.f32.vlgmr.msra.gmra.mxu1 %vm165_vm2, %v3158_v12  ;;  %4153 = vmatprep.subr.mxu0 %v3744_v14  ;;  %v3756_v12 = vld [vmem:[%s4932_s7 + $0x58] sm:$0xff] }
0x1861   :  { %4154 = vmatpush3.msra.mxu0 %v3744_v14  ;;  %v3753_v14 = vld [vmem:[%s4932_s7 + $0x40] sm:$0xff] }
0x1862   :  { %4155 = vmatprep.subr.mxu0 %v3743_v15 }
0x1863   :  { %4156 = vmatpush3.msra.mxu0 %v3743_v15  ;;  %v3798_v15 = vld [vmem:[%s4935_s6 + $0x1] ss:$0 sm:$0xff] }
0x1864   :  { %4171 = vmatprep.subr.mxu0 %v3760_v52 }
0x191c   :  { %v3231_v16 = vpop.f32.mrf.mxu0 }
0x191d   :  { %3329 = vrot.lane.b32.xlu0 %v3231_v16, %s4951_s14 }
0x191e   :  { %v4143_v11 = vpop.f32.mrf.mxu0 }
0x1920   :  { %v3307_v17 = vpop.f32.mrf.mxu1 }
0x1921   :  { %3331 = vrot.lane.b32.xlu1 %v3307_v17, %s4951_s14 }
0x1922   :  { %v4148_v18 = vpop.f32.mrf.mxu1 }
0x198f   :  { %v3330_v25 = vpop.permute.xlu0 %3329 }
0x1990   :  { %v3339_v26 = vsel %vm1510_vm3, %v3337_v24, %v3330_v25 }
0x1991   :  { %4157 = vmatprep.mubr.msk.f32.mxu0 %vm80_vm0, %v3339_v26 }
0x1993   :  { %v3332_v29 = vpop.permute.xlu1 %3331 }
0x1994   :  { %v3340_v30 = vsel %vm1510_vm3, %v3338_v28, %v3332_v29 }
0x1995   :  { %4158 = vmatmul.mubr.msk.f32.vlgmr.msra.gmra.mxu0 %vm80_vm0, %v3340_v30 }
0x1996   :  { %4172 = vmatpush3.msra.mxu0 %v3760_v52 }
0x1997   :  { %4173 = vmatprep.subr.mxu0 %v3759_v53 }
0x1998   :  { %4174 = vmatpush3.msra.mxu0 %v3759_v53 }
0x1999   :  { %4175 = vmatprep.subr.mxu0 %v3758_v5 }
0x199a   :  { %4176 = vmatpush3.msra.mxu0 %v3758_v5 }
0x199b   :  { %4177 = vmatprep.subr.mxu0 %v3757_v6 }
0x199c   :  { %4178 = vmatpush3.msra.mxu0 %v3757_v6 }
0x199d   :  { %4179 = vmatprep.subr.mxu0 %v3756_v12 }
0x199e   :  { %4180 = vmatpush3.msra.mxu0 %v3756_v12 }
0x199f   :  { %4181 = vmatprep.subr.mxu0 %v3755_v10 }
0x19a0   :  { %4182 = vmatpush3.msra.mxu0 %v3755_v10 }
0x19a1   :  { %4183 = vmatprep.subr.mxu0 %v3754_v13 }
0x19a2   :  { %4184 = vmatpush3.msra.mxu0 %v3754_v13 }
0x19a3   :  { %4185 = vmatprep.subr.mxu0 %v3753_v14 }
0x19a4   :  { %4186 = vmatpush3.msra.mxu0 %v3753_v14 }
0x1a55   :  { %v4159_v31 = vpop.f32.mrf.mxu0 }
0x1a56   :  { %v3425_v32 = vadd.f32 %v4159_v31, %v3793_v37 }
0x1a57   :  { %v3419_v33 = vpop.f32.mrf.mxu0 }
0x1a58   :  { %v3429_v34 = vadd.f32 %v3425_v32, %v4666_v63  ;;  %v3420_v35 = vadd.f32 %v3793_v37, %v3419_v33 }
0x1a5a   :  { %v3433_v42 = vsel %vm80_vm0, %v3429_v34, 0.0  ;;  %v3428_v39 = vadd.f32 %v3420_v35, %v4664_v62  ;;  %v3751_v62 = vld [vmem:[%s4931_s5 + $0x38] sm:$0xff] }
0x1a5b   :  { %3434 = vadd.xlane.f32.xlu1 %v3433_v42  ;;  %4160 = vmatprep.subr.mxu1 %v3751_v62 }
0x1a5c   :  { %v3430_v36 = vsel %vm80_vm0, %v3428_v39, 0.0  ;;  %4161 = vmatpush3.msra.mxu1 %v3751_v62  ;;  %v3805_v62 = vld [vmem:[%s4938_s12 + $0x1] ss:$0 sm:$0xff] }
0x1a5d   :  { %3431 = vadd.xlane.f32.xlu0 %v3430_v36  ;;  %4162 = vmatprep.subr.mxu1 %v3750_v49 }
0x1a5e   :  { %4163 = vmatpush3.msra.mxu1 %v3750_v49 }
0x1a5f   :  { %4164 = vmatprep.subr.mxu1 %v3749_v50 }
0x1a60   :  { %4165 = vmatpush3.msra.mxu1 %v3749_v50 }
0x1a61   :  { %4166 = vmatprep.subr.mxu1 %v3748_v51 }
0x1a62   :  { %4167 = vmatpush3.msra.mxu1 %v3748_v51 }
0x1ae4   :  { %v3435_v38 = vpop.xlane.xlu1 %3434 }
0x1ae5   :  { %v3437_v40 = vmul.f32 0.03125, %v3435_v38 }
0x1ae6   :  { %v3432_v41 = vpop.xlane.xlu0 %3431 }
0x1ae7   :  { %v3436_v44 = vmul.f32 0.03125, %v3432_v41  ;;  %v3439_v43 = vsub.f32 %v3429_v34, %v3437_v40 }
0x1ae9   :  { %v3438_v45 = vsub.f32 %v3428_v39, %v3436_v44  ;;  %v3441_v48 = vmul.f32 %v3439_v43, %v3439_v43 }
0x1aeb   :  { %v3440_v46 = vmul.f32 %v3438_v45, %v3438_v45  ;;  %v3445_v63 = vsel %vm80_vm0, %v3441_v48, 0.0 }
0x1aed   :  { %v3442_v47 = vsel %vm80_vm0, %v3440_v46, 0.0 }
0x1aee   :  { %3443 = vadd.xlane.f32.xlu0 %v3442_v47  ;;  %v3804_v47 = vld [vmem:[%s4937_s11 + $0x1] ss:$0 sm:$0xff] }
0x1af2   :  { %3446 = vadd.xlane.f32.xlu0 %v3445_v63 }
0x1b77   :  { %v3444_v2 = vpop.xlane.xlu0 %3443 }
0x1b78   :  { %v3448_v54 = vmul.f32 0.03125, %v3444_v2 }
0x1b7a   :  { %v3450_v55 = vadd.f32 1e-05, %v3448_v54 }
0x1b7b   :  { %v3447_v56 = vpop.xlane.xlu0 %3446 }
0x1b7c   :  { %4278 = vrsqrt.f32 %v3450_v55  ;;  %v3449_v57 = vmul.f32 0.03125, %v3447_v56 }
0x1b7e   :  { %v3451_v58 = vadd.f32 1e-05, %v3449_v57 }
0x1b80   :  { %4280 = vrsqrt.f32 %v3451_v58 }
0x1b89   :  { %v4279_v59 = vpop.eup %4278 }
0x1b8a   :  { %v3454_v60 = vmul.f32 %v4279_v59, %v3438_v45 }
0x1b8c   :  { %v3462_v0 = vmul.f32 %v3796_v4, %v3454_v60 }
0x1b8d   :  { %v4281_v1 = vpop.eup %4280 }
0x1b8e   :  { %v3455_v3 = vmul.f32 %v4281_v1, %v3439_v43  ;;  %v3470_v7 = vadd.f32 %v3797_v61, %v3462_v0 }
0x1b90   :  { %v3463_v8 = vmul.f32 %v3796_v4, %v3455_v3  ;;  %4168 = vmatprep.mubr.msk.f32.mxu1 %vm80_vm0, %v3470_v7 }
0x1b92   :  { %v3471_v9 = vadd.f32 %v3797_v61, %v3463_v8 }
0x1b94   :  { %4169 = vmatmul.mubr.msk.f32.vlgmr.msra.gmra.mxu1 %vm80_vm0, %v3471_v9 }
0x1c54   :  { %v4170_v16 = vpop.f32.mrf.mxu1 }
0x1c55   :  { %v3556_v11 = vadd.f32 %v4170_v16, %v3798_v15 }
0x1c56   :  { %v3550_v17 = vpop.f32.mrf.mxu1 }
0x1c57   :  { %v3551_v18 = vadd.f32 %v3798_v15, %v3550_v17  ;;  %v3560_v20 = vmax.f32 %v3556_v11, 0.0 }
0x1c59   :  { %v3559_v19 = vmax.f32 %v3551_v18, 0.0 }
0x1c5b   :  { %4187 = vmatprep.mubr.msk.f32.mxu0 %vm1740_vm5, %v3559_v19 }
0x1c5c   :  { %4188 = vmatmul.mubr.msk.f32.vlgmr.msra.gmra.mxu0 %vm1740_vm5, %v3560_v20 }
0x1d1c   :  { %v4189_v22 = vpop.f32.mrf.mxu0 }
0x1d1d   :  { %v3645_v23 = vadd.f32 %v4189_v22, %v3801_v21 }
0x1d1e   :  { %v3639_v24 = vpop.f32.mrf.mxu0 }
0x1d1f   :  { %v3640_v25 = vadd.f32 %v3801_v21, %v3639_v24  ;;  %v3649_v26 = vadd.f32 %v3645_v23, %v3471_v9 }
0x1d21   :  { %v3648_v27 = vadd.f32 %v3640_v25, %v3470_v7  ;;  %v3653_v28 = vsel %vm80_vm0, %v3649_v26, 0.0 }
0x1d22   :  { %3654 = vadd.xlane.f32.xlu0 %v3653_v28 }
0x1d23   :  { %v3650_v29 = vsel %vm80_vm0, %v3648_v27, 0.0 }
0x1d24   :  { %3651 = vadd.xlane.f32.xlu1 %v3650_v29 }
0x1dab   :  { %v3655_v30 = vpop.xlane.xlu0 %3654 }
0x1dac   :  { %v3657_v37 = vmul.f32 0.03125, %v3655_v30 }
0x1dad   :  { %v3652_v31 = vpop.xlane.xlu1 %3651 }
0x1dae   :  { %v3659_v32 = vsub.f32 %v3649_v26, %v3657_v37  ;;  %v3656_v33 = vmul.f32 0.03125, %v3652_v31 }
0x1db0   :  { %v3658_v34 = vsub.f32 %v3648_v27, %v3656_v33  ;;  %v3661_v35 = vmul.f32 %v3659_v32, %v3659_v32 }
0x1db2   :  { %v3665_v42 = vsel %vm80_vm0, %v3661_v35, 0.0  ;;  %v3660_v39 = vmul.f32 %v3658_v34, %v3658_v34 }
0x1db3   :  { %3666 = vadd.xlane.f32.xlu0 %v3665_v42 }
0x1db4   :  { %v3662_v36 = vsel %vm80_vm0, %v3660_v39, 0.0 }
0x1db5   :  { %3663 = vadd.xlane.f32.xlu1 %v3662_v36 }
0x1e3c   :  { %v3667_v38 = vpop.xlane.xlu0 %3666 }
0x1e3d   :  { %v3669_v40 = vmul.f32 0.03125, %v3667_v38 }
0x1e3e   :  { %v3664_v41 = vpop.xlane.xlu1 %3663 }
0x1e3f   :  { %v3671_v44 = vadd.f32 1e-05, %v3669_v40  ;;  %v3668_v43 = vmul.f32 0.03125, %v3664_v41 }
0x1e41   :  { %4282 = vrsqrt.f32 %v3671_v44  ;;  %v3670_v45 = vadd.f32 1e-05, %v3668_v43 }
0x1e43   :  { %4284 = vrsqrt.f32 %v3670_v45 }
0x1e4e   :  { %v4283_v46 = vpop.eup %4282 }
0x1e4f   :  { %v3675_v48 = vmul.f32 %v4283_v46, %v3659_v32 }
0x1e50   :  { %v4285_v63 = vpop.eup %4284 }
0x1e51   :  { %v3683_v49 = vmul.f32 %v3804_v47, %v3675_v48  ;;  %v3674_v50 = vmul.f32 %v4285_v63, %v3658_v34 }
0x1e53   :  { %v3691_v51 = vadd.f32 %v3805_v62, %v3683_v49  ;;  %v3682_v52 = vmul.f32 %v3804_v47, %v3674_v50 }
0x1e55   :  { %3693 = vst.msk [vmem:[%s4939_s13 + $0x8] sm:$0xff] %vm80_vm0, %v3691_v51  ;;  %v3690_v53 = vadd.f32 %v3805_v62, %v3682_v52 }
0x1e57   :  { %3692 = vst.msk [vmem:[%s4939_s13] sm:$0xff] %vm80_vm0, %v3690_v53 }

</bundles_post_ra>
